<compile_context>
chip_gen: v7x
topology: tpu7x:2x2x1
jax: 0.10.0
libtpu: 0.0.40
codegen_flags: <defaults>
</compile_context>

<pallas_src>
import jax
import jax.numpy as jnp
from jax.experimental import pallas as pl
from jax.experimental.pallas import tpu as pltpu


def _round_up(x, m):
    return ((x + m - 1) // m) * m


def _cconv_matmul_kernel(pr_ref, pi_ref, w_ref, b_ref, or_ref, oi_ref):
    """Fused complex GEMM tile.

    pr_ref/pi_ref : (tm, tk)   bf16  im2col patches of real / imag parts
    w_ref         : (tk, 2*Cp) bf16  [Wr | Wi] stacked along N
    b_ref         : (2, Cp)    f32   row0 = br - bi, row1 = br + bi
    or_ref/oi_ref : (tm, Cp)   f32   real / imag outputs (resident over K)
    """
    coutp = or_ref.shape[1]

    @pl.when(pl.program_id(1) == 0)
    def _():
        # Outputs are resident across the K axis: seed them with the bias.
        or_ref[...] = jnp.broadcast_to(b_ref[0:1, :], or_ref.shape)
        oi_ref[...] = jnp.broadcast_to(b_ref[1:2, :], oi_ref.shape)

    zr = jnp.dot(pr_ref[...], w_ref[...], preferred_element_type=jnp.float32)
    zi = jnp.dot(pi_ref[...], w_ref[...], preferred_element_type=jnp.float32)
    # zr = [pr@Wr | pr@Wi], zi = [pi@Wr | pi@Wi]; lane slices are 128-aligned.
    or_ref[...] += zr[:, :coutp] - zi[:, coutp:]
    oi_ref[...] += zi[:, :coutp] + zr[:, coutp:]


def _im2col_nchw(x, kh, kw, stride, padding, dilation):
    """(N, C, H, W) -> (N*Ho*Wo, C*kh*kw) conv patches (pure layout work)."""
    n, c, h, w = x.shape
    if padding > 0:
        x = jnp.pad(x, ((0, 0), (0, 0), (padding, padding), (padding, padding)))
    hp, wp = h + 2 * padding, w + 2 * padding
    ho = (hp - dilation * (kh - 1) - 1) // stride + 1
    wo = (wp - dilation * (kw - 1) - 1) // stride + 1
    cols = []
    for i in range(kh):
        for j in range(kw):
            hi, wj = i * dilation, j * dilation
            cols.append(x[:, :, hi:hi + (ho - 1) * stride + 1:stride,
                          wj:wj + (wo - 1) * stride + 1:stride])  # (N,C,Ho,Wo)
    p = jnp.stack(cols, axis=2)            # (N, C, kh*kw, Ho, Wo)
    p = p.transpose(0, 3, 4, 1, 2)         # (N, Ho, Wo, C, kh*kw)
    return p.reshape(n * ho * wo, c * kh * kw), ho, wo


# Conservative scoped-VMEM budget: safe under v5e's 16 MiB default and leaves
# headroom on v7x (64 MiB physical / 32 MiB scoped default).
_VMEM_BUDGET = 12 * 1024 * 1024


def _vmem_estimate(tm, tk, kp, coutp):
    bf, f32 = 2, 4
    a_bufs = 2 * 2 * tm * tk * bf                      # pr + pi, double-buffered
    w_bufs = (1 if tk == kp else 2) * tk * (2 * coutp) * bf
    o_bufs = 2 * 2 * tm * coutp * f32                  # real + imag outputs
    return a_bufs + w_bufs + o_bufs + 2 * coutp * f32


def _select_tiles(m_dim, k_dim, coutp, tm_req):
    tm = min(_round_up(m_dim, 128), _round_up(tm_req, 128))
    kp = _round_up(k_dim, 128)
    tk = kp                                            # prefer K fully resident
    if _vmem_estimate(tm, tk, kp, coutp) > _VMEM_BUDGET:
        tk = 512                                       # fall back to K tiling
        kp = _round_up(k_dim, tk)
        while _vmem_estimate(tm, tk, kp, coutp) > _VMEM_BUDGET and tm > 128:
            tm = max(128, _round_up(tm // 2, 128))
    return tm, tk, kp


def complex_conv2d(x, wr, wi, br=None, bi=None, *, stride=1, padding=0,
                   dilation=1, groups=1, tm=512):
    """ComplexConv2d.forward equivalent.

    x       : complex64, (N, Cin, H, W)
    wr, wi  : float32 Conv2d weights, (Cout, Cin, kh, kw)
    br, bi  : float32 biases, (Cout,) or None
    """
    if groups != 1:
        raise NotImplementedError("groups != 1 not supported")  # see TODO above

    n, cin, _, _ = x.shape
    cout, _, kh, kw = wr.shape
    if br is None:
        br = jnp.zeros((cout,), jnp.float32)
    if bi is None:
        bi = jnp.zeros((cout,), jnp.float32)

    xr = jnp.real(x).astype(jnp.float32)
    xi = jnp.imag(x).astype(jnp.float32)

    pr, ho, wo = _im2col_nchw(xr, kh, kw, stride, padding, dilation)
    pi, _, _ = _im2col_nchw(xi, kh, kw, stride, padding, dilation)

    k_dim = cin * kh * kw
    m_dim = pr.shape[0]
    coutp = _round_up(cout, 128)
    tm, tk, kp = _select_tiles(m_dim, k_dim, coutp, tm)
    mp = _round_up(m_dim, tm)

    # bf16 operands (native MXU path), f32 accumulation inside the kernel.
    pr_p = jnp.pad(pr, ((0, mp - m_dim), (0, kp - k_dim))).astype(jnp.bfloat16)
    pi_p = jnp.pad(pi, ((0, mp - m_dim), (0, kp - k_dim))).astype(jnp.bfloat16)

    wr_m = wr.reshape(cout, k_dim).T.astype(jnp.float32)   # (K, Cout)
    wi_m = wi.reshape(cout, k_dim).T.astype(jnp.float32)
    wr_pd = jnp.pad(wr_m, ((0, kp - k_dim), (0, coutp - cout)))
    wi_pd = jnp.pad(wi_m, ((0, kp - k_dim), (0, coutp - cout)))
    w_stack = jnp.concatenate([wr_pd, wi_pd], axis=1).astype(jnp.bfloat16)

    b_rows = jnp.stack([br - bi, br + bi], axis=0).astype(jnp.float32)
    b_rows = jnp.pad(b_rows, ((0, 0), (0, coutp - cout)))  # (2, Cp)

    n_m, n_k = mp // tm, kp // tk
    flops = 2 * 2 * mp * kp * (2 * coutp)
    bytes_accessed = (2 * mp * kp * 2                      # pr + pi (bf16)
                      + n_m * kp * 2 * coutp * 2           # weights (re-read/M tile if K tiled; =1 read when resident)
                      + 2 * mp * coutp * 4)                # outputs (f32)

    out_r, out_i = pl.pallas_call(
        _cconv_matmul_kernel,
        out_shape=(jax.ShapeDtypeStruct((mp, coutp), jnp.float32),
                   jax.ShapeDtypeStruct((mp, coutp), jnp.float32)),
        grid_spec=pltpu.PrefetchScalarGridSpec(
            num_scalar_prefetch=0,
            grid=(n_m, n_k),
            in_specs=[
                pl.BlockSpec((tm, tk), lambda i, k: (i, k)),
                pl.BlockSpec((tm, tk), lambda i, k: (i, k)),
                pl.BlockSpec((tk, 2 * coutp), lambda i, k: (k, 0)),
                pl.BlockSpec((2, coutp), lambda i, k: (0, 0)),
            ],
            out_specs=(pl.BlockSpec((tm, coutp), lambda i, k: (i, 0)),
                       pl.BlockSpec((tm, coutp), lambda i, k: (i, 0))),
        ),
        compiler_params=pltpu.CompilerParams(
            dimension_semantics=("parallel", "arbitrary")),
        cost_estimate=pl.CostEstimate(
            flops=flops, transcendentals=0, bytes_accessed=bytes_accessed),
    )(pr_p, pi_p, w_stack, b_rows)

    out_r = out_r[:m_dim, :cout].reshape(n, ho, wo, cout).transpose(0, 3, 1, 2)
    out_i = out_i[:m_dim, :cout].reshape(n, ho, wo, cout).transpose(0, 3, 1, 2)
    return jax.lax.complex(out_r, out_i).astype(jnp.complex64)


if __name__ == "__main__":
    key = jax.random.PRNGKey(0)
    k1, k2, k3, k4, k5, k6 = jax.random.split(key, 6)

    Nb, Cin, H, W = 2, 4, 16, 16
    Cout, ksz, stride, padding = 8, 3, 1, 1

    xr = jax.random.normal(k1, (Nb, Cin, H, W), dtype=jnp.float32)
    xi = jax.random.normal(k2, (Nb, Cin, H, W), dtype=jnp.float32)
    x = jax.lax.complex(xr, xi)

    fan_in = Cin * ksz * ksz
    bound = 1.0 / (fan_in ** 0.5)
    wr = jax.random.uniform(k3, (Cout, Cin, ksz, ksz), jnp.float32, -bound, bound)
    wi = jax.random.uniform(k4, (Cout, Cin, ksz, ksz), jnp.float32, -bound, bound)
    br = jax.random.uniform(k5, (Cout,), jnp.float32, -bound, bound)
    bi = jax.random.uniform(k6, (Cout,), jnp.float32, -bound, bound)

    y = complex_conv2d(x, wr, wi, br, bi, stride=stride, padding=padding)
    y = jax.block_until_ready(y)

    # Pure-JAX reference via XLA real convolutions (apply_complex semantics).
    def conv(lhs, w, b):
        o = jax.lax.conv_general_dilated(
            lhs, w, window_strides=(stride, stride),
            padding=[(padding, padding), (padding, padding)],
            dimension_numbers=("NCHW", "OIHW", "NCHW"))
        return o + b[None, :, None, None]

    ref_r = conv(xr, wr, br) - conv(xi, wi, bi)
    ref_i = conv(xi, wr, br) + conv(xr, wi, bi)
    ref = jax.lax.complex(ref_r, ref_i)

    assert y.shape == ref.shape and y.dtype == jnp.complex64
    err = float(jnp.max(jnp.abs(y - ref)))
    # bf16 operands, f32 accumulation (K = 2*Cin*kh*kw terms) -> O(1e-2) max err.
    assert err < 3e-2, err

    print("KERNEL_OK")
</pallas_src>

<mosaic_0001>
module attributes {stable_mosaic.version = 11 : i64} {
  func.func @_cconv_matmul_kernel(%arg0: i32, %arg1: i32, %arg2: memref<512x128xbf16, #tpu.memory_space<vmem>>, %arg3: memref<512x128xbf16, #tpu.memory_space<vmem>>, %arg4: memref<128x256xbf16, #tpu.memory_space<vmem>>, %arg5: memref<2x128xf32, #tpu.memory_space<vmem>>, %arg6: memref<512x128xf32, #tpu.memory_space<vmem>>, %arg7: memref<512x128xf32, #tpu.memory_space<vmem>>) attributes {dimension_semantics = [#tpu.dimension_semantics<parallel>, #tpu.dimension_semantics<arbitrary>], iteration_bounds = array<i64: 1, 1>, scalar_prefetch = 0 : i64, scratch_operands = 0 : i64, tpu.core_type = #tpu.core_type<tc>, window_params = [{transform_indices = @transform_0, window_bounds = array<i64: 512, 128>}, {transform_indices = @transform_1, window_bounds = array<i64: 512, 128>}, {transform_indices = @transform_2, window_bounds = array<i64: 128, 256>}, {pipeline_mode = #tpu.pipeline_mode<synchronous>, transform_indices = @transform_3, window_bounds = array<i64: 2, 128>}, {transform_indices = @transform_4, window_bounds = array<i64: 512, 128>}, {transform_indices = @transform_5, window_bounds = array<i64: 512, 128>}]} {
    %c0_i32 = arith.constant 0 : i32
    %0 = arith.cmpi eq, %arg1, %c0_i32 : i32
    %1 = arith.extui %0 : i1 to i32
    %c0_i32_0 = arith.constant 0 : i32
    %2 = arith.cmpi ne, %1, %c0_i32_0 : i32
    scf.if %2 {
      %c0_17 = arith.constant 0 : index
      %c0_18 = arith.constant 0 : index
      %21 = vector.load %arg5[%c0_17, %c0_18] : memref<2x128xf32, #tpu.memory_space<vmem>>, vector<1x128xf32>
      %22 = vector.shape_cast %21 : vector<1x128xf32> to vector<1x128xf32>
      %23 = vector.broadcast %22 : vector<1x128xf32> to vector<512x128xf32>
      %c0_19 = arith.constant 0 : index
      %c0_20 = arith.constant 0 : index
      %24 = vector.load %arg6[%c0_19, %c0_20] : memref<512x128xf32, #tpu.memory_space<vmem>>, vector<512x128xf32>
      tpu.vector_store %arg6[%c0_19, %c0_20], %23 {strides = array<i32>} : memref<512x128xf32, #tpu.memory_space<vmem>>, vector<512x128xf32>,
      %c1 = arith.constant 1 : index
      %c0_21 = arith.constant 0 : index
      %25 = vector.load %arg5[%c1, %c0_21] : memref<2x128xf32, #tpu.memory_space<vmem>>, vector<1x128xf32>
      %26 = vector.shape_cast %25 : vector<1x128xf32> to vector<1x128xf32>
      %27 = vector.broadcast %26 : vector<1x128xf32> to vector<512x128xf32>
      %c0_22 = arith.constant 0 : index
      %c0_23 = arith.constant 0 : index
      %28 = vector.load %arg7[%c0_22, %c0_23] : memref<512x128xf32, #tpu.memory_space<vmem>>, vector<512x128xf32>
      tpu.vector_store %arg7[%c0_22, %c0_23], %27 {strides = array<i32>} : memref<512x128xf32, #tpu.memory_space<vmem>>, vector<512x128xf32>,
    } else {
    }
    %c0 = arith.constant 0 : index
    %c0_1 = arith.constant 0 : index
    %3 = vector.load %arg2[%c0, %c0_1] : memref<512x128xbf16, #tpu.memory_space<vmem>>, vector<512x128xbf16>
    %c0_2 = arith.constant 0 : index
    %c0_3 = arith.constant 0 : index
    %4 = vector.load %arg4[%c0_2, %c0_3] : memref<128x256xbf16, #tpu.memory_space<vmem>>, vector<128x256xbf16>
    %cst = arith.constant dense<0.000000e+00> : vector<512x256xf32>
    %5 = tpu.matmul %3, %4, %cst {dimension_numbers = #tpu.dot_dimension_numbers<[1], [0], [0], [1], [0, 0, 1, 1], [], []>} : vector<512x128xbf16>, vector<128x256xbf16>, vector<512x256xf32> -> vector<512x256xf32>
    %c0_4 = arith.constant 0 : index
    %c0_5 = arith.constant 0 : index
    %6 = vector.load %arg3[%c0_4, %c0_5] : memref<512x128xbf16, #tpu.memory_space<vmem>>, vector<512x128xbf16>
    %c0_6 = arith.constant 0 : index
    %c0_7 = arith.constant 0 : index
    %7 = vector.load %arg4[%c0_6, %c0_7] : memref<128x256xbf16, #tpu.memory_space<vmem>>, vector<128x256xbf16>
    %cst_8 = arith.constant dense<0.000000e+00> : vector<512x256xf32>
    %8 = tpu.matmul %6, %7, %cst_8 {dimension_numbers = #tpu.dot_dimension_numbers<[1], [0], [0], [1], [0, 0, 1, 1], [], []>} : vector<512x128xbf16>, vector<128x256xbf16>, vector<512x256xf32> -> vector<512x256xf32>
    %c0_9 = arith.constant 0 : index
    %c0_10 = arith.constant 0 : index
    %9 = vector.load %arg6[%c0_9, %c0_10] : memref<512x128xf32, #tpu.memory_space<vmem>>, vector<512x128xf32>
    %10 = vector.extract_strided_slice %5 {offsets = [0, 0], sizes = [512, 128], strides = [1, 1]} : vector<512x256xf32> to vector<512x128xf32>
    %11 = vector.extract_strided_slice %8 {offsets = [0, 128], sizes = [512, 128], strides = [1, 1]} : vector<512x256xf32> to vector<512x128xf32>
    %12 = arith.subf %10, %11 : vector<512x128xf32>
    %13 = arith.addf %9, %12 : vector<512x128xf32>
    %c0_11 = arith.constant 0 : index
    %c0_12 = arith.constant 0 : index
    %14 = vector.load %arg6[%c0_11, %c0_12] : memref<512x128xf32, #tpu.memory_space<vmem>>, vector<512x128xf32>
    tpu.vector_store %arg6[%c0_11, %c0_12], %13 {strides = array<i32>} : memref<512x128xf32, #tpu.memory_space<vmem>>, vector<512x128xf32>,
    %c0_13 = arith.constant 0 : index
    %c0_14 = arith.constant 0 : index
    %15 = vector.load %arg7[%c0_13, %c0_14] : memref<512x128xf32, #tpu.memory_space<vmem>>, vector<512x128xf32>
    %16 = vector.extract_strided_slice %8 {offsets = [0, 0], sizes = [512, 128], strides = [1, 1]} : vector<512x256xf32> to vector<512x128xf32>
    %17 = vector.extract_strided_slice %5 {offsets = [0, 128], sizes = [512, 128], strides = [1, 1]} : vector<512x256xf32> to vector<512x128xf32>
    %18 = arith.addf %16, %17 : vector<512x128xf32>
    %19 = arith.addf %15, %18 : vector<512x128xf32>
    %c0_15 = arith.constant 0 : index
    %c0_16 = arith.constant 0 : index
    %20 = vector.load %arg7[%c0_15, %c0_16] : memref<512x128xf32, #tpu.memory_space<vmem>>, vector<512x128xf32>
    tpu.vector_store %arg7[%c0_15, %c0_16], %19 {strides = array<i32>} : memref<512x128xf32, #tpu.memory_space<vmem>>, vector<512x128xf32>,
    return
  }
  func.func @transform_0(%arg0: i32, %arg1: i32) -> (i32, i32) {
    %c0_i32 = arith.constant 0 : i32
    return %arg0, %arg1 : i32, i32
  }
  func.func @transform_1(%arg0: i32, %arg1: i32) -> (i32, i32) {
    %c0_i32 = arith.constant 0 : i32
    return %arg0, %arg1 : i32, i32
  }
  func.func @transform_2(%arg0: i32, %arg1: i32) -> (i32, i32) {
    %c0_i32 = arith.constant 0 : i32
    %c0_i32_0 = arith.constant 0 : i32
    return %arg1, %c0_i32 : i32, i32
  }
  func.func @transform_3(%arg0: i32, %arg1: i32) -> (i32, i32) {
    %c0_i32 = arith.constant 0 : i32
    %c0_i32_0 = arith.constant 0 : i32
    %c0_i32_1 = arith.constant 0 : i32
    return %c0_i32, %c0_i32_0 : i32, i32
  }
  func.func @transform_4(%arg0: i32, %arg1: i32) -> (i32, i32) {
    %c0_i32 = arith.constant 0 : i32
    %c0_i32_0 = arith.constant 0 : i32
    return %arg0, %c0_i32 : i32, i32
  }
  func.func @transform_5(%arg0: i32, %arg1: i32) -> (i32, i32) {
    %c0_i32 = arith.constant 0 : i32
    %c0_i32_0 = arith.constant 0 : i32
    return %arg0, %c0_i32 : i32, i32
  }
}

</mosaic_0001>

<bundles_post_ra>
// kernel: tpu_custom_call.1
= control target key start
LH: loop header
LB: loop body
LE: loop exit
PB: predicated region body
PF: predicated region fallthrough
CT: control target
= control target key end

     0   :  { %11 = vsyncpa [#allocation3], 0  ;;  %s2688_s0 = inlined_call_operand.hbm [shape: bf16[512,128], index: 0, kind: input, shape index: {}]   ;;  %s2689_s1 = inlined_call_operand.hbm [shape: bf16[512,128], index: 1, kind: input, shape index: {}]   ;;  %s2690_s2 = inlined_call_operand.hbm [shape: bf16[128,256], index: 2, kind: input, shape index: {}]   ;;  %s2691_s3 = inlined_call_operand.vmem [shape: f32[2,128], index: 3, kind: input, shape index: {}]   ;;  %s2692_s4 = inlined_call_operand.hbm [shape: f32[512,128], index: 4, kind: output, shape index: {0}]   ;;  %s2693_s5 = inlined_call_operand.hbm [shape: f32[512,128], index: 5, kind: output, shape index: {1}]  }
   0x1   :  { %12 = vsyncpa [#allocation6], 0 }
   0x2   :  { %13 = vsyncpa [#allocation4], 0 }
   0x3   :  { %14 = vsyncpa [#allocation10], 0  ;;  %s2364_s18 = smov [#allocation5]   ;;  %s2365_s20 = smov [#allocation2]  }
   0x4   :  { %s32_s19 = sshll.u32 %s2364_s18, 4  ;;  %s20_s21 = sshll.u32 %s2365_s20, 4  ;;  %s33_s19 = int_to_ptr.vmem [resolvable:$true] %s32_s19  ;;  %s2404_s21 = int_to_ptr.vmem [resolvable:$true] %s20_s21 }
   0x5   :  { %s2246_s24 = scalar_lea.hbm %s2689_s1, 4096 }
   0x6   :  { %p2247_p0 = scmp.ne.s32.totalorder %s2689_s1, %s2246_s24  ;;  %p2250_p1 = scmp.lt.u32.totalorder %s2246_s24, %s2689_s1 }
   0x8   :  { %p2252_p2 = pnand %p2250_p1, %p2247_p0 }
   0xa   :  { %2255 = shalt.err (!%p2252_p2)
}
   0xb   :  { %s2256_s29 = scalar_lea.vmem %s33_s19, 4096  ;;  %p2261_p4 = scmp.lt.s32.totalorder %s33_s19, %s33_s19 }
   0xc   :  { %p2257_p3 = scmp.ne.s32.totalorder %s33_s19, %s2256_s29  ;;  %p2262_p5 = scmp.lt.s32.totalorder %s2256_s29, %s2256_s29 }
   0xe   :  { %p2263_p6 = por %p2262_p5, %p2261_p4 }
  0x10   :  { %p2264_p7 = pnand %p2263_p6, %p2257_p3 }
  0x12   :  { %2267 = shalt.err (!%p2264_p7)
}
  0x13   :  { %s2366_s30 = smov 64   ;;  %s2367_s6 = smov 4  }
  0x14   :  { %38 = dma.hbm_to_vmem [thread:$0]  %s2689_s1, 4096, %s33_s19, [#allocation6], %s2366_s30, %s2366_s30, %s2367_s6  }
  0x15   :  { %s2268_s11 = scalar_lea.hbm %s2688_s0, 4096 }
  0x16   :  { %p2269_p8 = scmp.ne.s32.totalorder %s2688_s0, %s2268_s11  ;;  %p2272_p9 = scmp.lt.u32.totalorder %s2268_s11, %s2688_s0 }
  0x18   :  { %p2274_p10 = pnand %p2272_p9, %p2269_p8 }
  0x1a   :  { %2277 = shalt.err (!%p2274_p10)
}
  0x1b   :  { %s2278_s16 = scalar_lea.vmem %s2404_s21, 4096  ;;  %p2283_p12 = scmp.lt.s32.totalorder %s2404_s21, %s2404_s21 }
  0x1c   :  { %p2279_p11 = scmp.ne.s32.totalorder %s2404_s21, %s2278_s16  ;;  %p2284_p13 = scmp.lt.s32.totalorder %s2278_s16, %s2278_s16 }
  0x1e   :  { %p2285_p0 = por %p2284_p13, %p2283_p12 }
  0x20   :  { %p2286_p1 = pnand %p2285_p0, %p2279_p11 }
  0x22   :  { %2289 = shalt.err (!%p2286_p1)
}
  0x23   :  { %26 = dma.hbm_to_vmem [thread:$0]  %s2688_s0, 4096, %s2404_s21, [#allocation3], %s2366_s30, %s2366_s30, %s2367_s6  }
  0x24   :  { %s2368_s18 = smov [#allocation7]   ;;  %s2290_s23 = scalar_lea.hbm %s2690_s2, 2048 }
  0x25   :  { %s44_s19 = sshll.u32 %s2368_s18, 4  ;;  %p2291_p2 = scmp.ne.s32.totalorder %s2690_s2, %s2290_s23  ;;  %s45_s19 = int_to_ptr.vmem [resolvable:$true] %s44_s19 }
  0x26   :  { %p2294_p3 = scmp.lt.u32.totalorder %s2290_s23, %s2690_s2 }
  0x28   :  { %p2296_p4 = pnand %p2294_p3, %p2291_p2 }
  0x2a   :  { %2299 = shalt.err (!%p2296_p4)
}
  0x2b   :  { %s2300_s28 = scalar_lea.vmem %s45_s19, 2048  ;;  %p2305_p6 = scmp.lt.s32.totalorder %s45_s19, %s45_s19 }
  0x2c   :  { %p2301_p5 = scmp.ne.s32.totalorder %s45_s19, %s2300_s28  ;;  %p2306_p7 = scmp.lt.s32.totalorder %s2300_s28, %s2300_s28 }
  0x2e   :  { %p2307_p8 = por %p2306_p7, %p2305_p6 }
  0x30   :  { %p2308_p9 = pnand %p2307_p8, %p2301_p5 }
  0x32   :  { %2311 = shalt.err (!%p2308_p9)
}
  0x33   :  { %s2369_s0 = smov 128   ;;  %s2370_s21 = smov 8  }
  0x34   :  { %50 = dma.hbm_to_vmem [thread:$0]  %s2690_s2, 2048, %s45_s19, [#allocation6], %s2369_s0, %s2369_s0, %s2370_s21  }
  0x35   :  { %2356 = dma.done.wait [#allocation3], 4096  }
  0x36   :  { %2357 = vsyncadd [#allocation3], 4294963200 }
  0x37   :  { %2358 = dma.done.wait [#allocation6], 6144  }
  0x38   :  { %2359 = vsyncadd [#allocation6], 4294961152  ;;  %v2371_v0 = vmov 0   ;;  %v2157_v1 = vld [vmem:[#allocation7 + $0x4] ss:$8 sps:$4 sm:$0xff]   ;;  %v2185_v21 = vld [vmem:[#allocation2 + $0x10] sm:$0xff]  }
  0x39   :  { %589 = vmatprep.mubr.bf16.mxu0 %v2371_v0  ;;  %1198 = vmatprep.mubr.bf16.mxu1 %v2371_v0  ;;  %v2159_v2 = vld [vmem:[#allocation7] ss:$8 sps:$4 sm:$0xff]   ;;  %v2160_v3 = vld [vmem:[#allocation7 + $0x14] ss:$8 sps:$4 sm:$0xff]   ;;  %v2162_v4 = vld [vmem:[#allocation7 + $0x10] ss:$8 sps:$4 sm:$0xff]  }
  0x3a   :  { %557 = vmatprep.subr.bf16.mxu0 %v2157_v1  ;;  %1166 = vmatprep.subr.bf16.mxu1 %v2157_v1  ;;  %v2163_v5 = vld [vmem:[#allocation7 + $0x24] ss:$8 sps:$4 sm:$0xff]   ;;  %v2165_v6 = vld [vmem:[#allocation7 + $0x20] ss:$8 sps:$4 sm:$0xff]   ;;  %v2166_v7 = vld [vmem:[#allocation7 + $0x34] ss:$8 sps:$4 sm:$0xff]  }
  0x3b   :  { %558 = vmatpush1.bf16.msra.mxu0 %v2159_v2  ;;  %1167 = vmatpush1.bf16.msra.mxu1 %v2159_v2  ;;  %v2168_v8 = vld [vmem:[#allocation7 + $0x30] ss:$8 sps:$4 sm:$0xff]   ;;  %v2169_v9 = vld [vmem:[#allocation7 + $0x44] ss:$8 sps:$4 sm:$0xff]   ;;  %v2171_v10 = vld [vmem:[#allocation7 + $0x40] ss:$8 sps:$4 sm:$0xff]  }
  0x3c   :  { %559 = vmatprep.subr.bf16.mxu0 %v2160_v3  ;;  %1168 = vmatprep.subr.bf16.mxu1 %v2160_v3  ;;  %v2172_v11 = vld [vmem:[#allocation7 + $0x54] ss:$8 sps:$4 sm:$0xff]   ;;  %v2174_v12 = vld [vmem:[#allocation7 + $0x50] ss:$8 sps:$4 sm:$0xff]   ;;  %v2175_v13 = vld [vmem:[#allocation7 + $0x64] ss:$8 sps:$4 sm:$0xff]  }
  0x3d   :  { %v2177_v14 = vld [vmem:[#allocation7 + $0x60] ss:$8 sps:$4 sm:$0xff]   ;;  %v2178_v15 = vld [vmem:[#allocation7 + $0x74] ss:$8 sps:$4 sm:$0xff]   ;;  %v2180_v16 = vld [vmem:[#allocation7 + $0x70] ss:$8 sps:$4 sm:$0xff]  }
  0x3e   :  { %v2181_v17 = vld [vmem:[#allocation2] sm:$0xff]   ;;  %v2183_v19 = vld [vmem:[#allocation2 + $0x8] sm:$0xff]   ;;  %v2186_v22 = vld [vmem:[#allocation5 + $0x10] sm:$0xff]   ;;  %s2373_s10 = smov [#allocation9]  }
  0x3f   :  { %560 = vmatpush1.bf16.msra.mxu0 %v2162_v4  ;;  %1169 = vmatpush1.bf16.msra.mxu1 %v2162_v4  ;;  %v2182_v18 = vld [vmem:[#allocation5] sm:$0xff]   ;;  %v2184_v20 = vld [vmem:[#allocation5 + $0x8] sm:$0xff]   ;;  %v2187_v23 = vld [vmem:[#allocation2 + $0x18] sm:$0xff]   ;;  %s2048_s11 = sshll.u32 %s2373_s10, 4  ;;  %s2651_s11 = int_to_ptr.vmem [resolvable:$true] %s2048_s11 }
  0x40   :  { %561 = vmatprep.subr.bf16.mxu0 %v2163_v5  ;;  %1170 = vmatprep.subr.bf16.mxu1 %v2163_v5  ;;  %v2188_v24 = vld [vmem:[#allocation5 + $0x18] sm:$0xff]   ;;  %v2189_v25 = vld [vmem:[#allocation2 + $0x20] sm:$0xff]   ;;  %v2191_v27 = vld [vmem:[#allocation2 + $0x28] sm:$0xff]  }
  0x41   :  { %v2190_v26 = vld [vmem:[#allocation5 + $0x20] sm:$0xff]   ;;  %v2192_v28 = vld [vmem:[#allocation5 + $0x28] sm:$0xff]   ;;  %v2193_v29 = vld [vmem:[#allocation2 + $0x30] sm:$0xff]  }
  0x42   :  { %v2194_v30 = vld [vmem:[#allocation5 + $0x30] sm:$0xff]   ;;  %v2195_v31 = vld [vmem:[#allocation2 + $0x38] sm:$0xff]   ;;  %v2197_v33 = vld [vmem:[#allocation2 + $0x40] sm:$0xff]  }
  0x43   :  { %562 = vmatpush1.bf16.msra.mxu0 %v2165_v6  ;;  %1171 = vmatpush1.bf16.msra.mxu1 %v2165_v6  ;;  %v2196_v32 = vld [vmem:[#allocation5 + $0x38] sm:$0xff]   ;;  %v2198_v34 = vld [vmem:[#allocation5 + $0x40] sm:$0xff]   ;;  %v2199_v35 = vld [vmem:[#allocation2 + $0x48] sm:$0xff]  }
  0x44   :  { %563 = vmatprep.subr.bf16.mxu0 %v2166_v7  ;;  %1172 = vmatprep.subr.bf16.mxu1 %v2166_v7  ;;  %v2200_v36 = vld [vmem:[#allocation5 + $0x48] sm:$0xff]   ;;  %v2201_v37 = vld [vmem:[#allocation2 + $0x50] sm:$0xff]   ;;  %v2477_v39 = vld [vmem:[%s2691_s3 + $0x1] ss:$0 sm:$0xff] }
  0x45   :  { %v2202_v38 = vld [vmem:[#allocation5 + $0x50] sm:$0xff]   ;;  %v2203_v40 = vld [vmem:[#allocation2 + $0x58] sm:$0xff]   ;;  %172 = vst [vmem:[#allocation9 + $0xf8] sm:$0xff] %v2477_v39  ;;  %173 = vst [vmem:[#allocation9 + $0x100] sm:$0xff] %v2477_v39 }
  0x46   :  { %v2204_v41 = vld [vmem:[#allocation5 + $0x58] sm:$0xff]   ;;  %174 = vst [vmem:[#allocation9 + $0x108] sm:$0xff] %v2477_v39  ;;  %175 = vst [vmem:[#allocation9 + $0x110] sm:$0xff] %v2477_v39  ;;  %v2515_v42 = vld [vmem:[%s2691_s3] ss:$0 sm:$0xff]  ;;  %s2372_s3 = smov [#allocation8]  }
  0x47   :  { %564 = vmatpush1.bf16.msra.mxu0 %v2168_v8  ;;  %1173 = vmatpush1.bf16.msra.mxu1 %v2168_v8  ;;  %176 = vst [vmem:[#allocation9 + $0x118] sm:$0xff] %v2477_v39  ;;  %177 = vst [vmem:[#allocation9 + $0x120] sm:$0xff] %v2477_v39  ;;  %v2205_v43 = vld [vmem:[#allocation2 + $0x60] sm:$0xff]   ;;  %v2207_v45 = vld [vmem:[#allocation2 + $0x68] sm:$0xff]   ;;  %s2036_s9 = sshll.u32 %s2372_s3, 4  ;;  %s2037_s9 = int_to_ptr.vmem [resolvable:$true] %s2036_s9 }
  0x48   :  { %565 = vmatprep.subr.bf16.mxu0 %v2169_v9  ;;  %1174 = vmatprep.subr.bf16.mxu1 %v2169_v9  ;;  %178 = vst [vmem:[#allocation9 + $0x128] sm:$0xff] %v2477_v39  ;;  %179 = vst [vmem:[#allocation9 + $0x130] sm:$0xff] %v2477_v39  ;;  %v2206_v44 = vld [vmem:[#allocation5 + $0x60] sm:$0xff]   ;;  %v2208_v46 = vld [vmem:[#allocation5 + $0x68] sm:$0xff]   ;;  %s2312_s12 = scalar_lea.vmem %s2037_s9, 8192  ;;  %p2317_p11 = scmp.lt.s32.totalorder %s2037_s9, %s2037_s9 }
  0x49   :  { %180 = vst [vmem:[#allocation9 + $0x138] sm:$0xff] %v2477_v39  ;;  %181 = vst [vmem:[#allocation9 + $0x140] sm:$0xff] %v2477_v39  ;;  %v2209_v47 = vld [vmem:[#allocation2 + $0x70] sm:$0xff]   ;;  %v2211_v49 = vld [vmem:[#allocation2 + $0x78] sm:$0xff]   ;;  %p2313_p10 = scmp.ne.s32.totalorder %s2037_s9, %s2312_s12  ;;  %p2318_p12 = scmp.lt.s32.totalorder %s2312_s12, %s2312_s12 }
  0x4a   :  { %182 = vst [vmem:[#allocation9 + $0x148] sm:$0xff] %v2477_v39  ;;  %183 = vst [vmem:[#allocation9 + $0x150] sm:$0xff] %v2477_v39  ;;  %v2210_v48 = vld [vmem:[#allocation5 + $0x70] sm:$0xff]   ;;  %v2212_v50 = vld [vmem:[#allocation5 + $0x78] sm:$0xff]  }
  0x4b   :  { %566 = vmatpush1.bf16.msra.mxu0 %v2171_v10  ;;  %1175 = vmatpush1.bf16.msra.mxu1 %v2171_v10  ;;  %184 = vst [vmem:[#allocation9 + $0x158] sm:$0xff] %v2477_v39  ;;  %185 = vst [vmem:[#allocation9 + $0x160] sm:$0xff] %v2477_v39  ;;  %v2213_v51 = vld [vmem:[#allocation2 + $0x80] sm:$0xff]   ;;  %v2215_v53 = vld [vmem:[#allocation2 + $0x88] sm:$0xff]   ;;  %p2319_p13 = por %p2318_p12, %p2317_p11 }
  0x4c   :  { %567 = vmatprep.subr.bf16.mxu0 %v2172_v11  ;;  %1176 = vmatprep.subr.bf16.mxu1 %v2172_v11  ;;  %186 = vst [vmem:[#allocation9 + $0x168] sm:$0xff] %v2477_v39  ;;  %187 = vst [vmem:[#allocation9 + $0x170] sm:$0xff] %v2477_v39  ;;  %v2214_v52 = vld [vmem:[#allocation5 + $0x80] sm:$0xff]   ;;  %v2216_v54 = vld [vmem:[#allocation5 + $0x88] sm:$0xff]  }
  0x4d   :  { %188 = vst [vmem:[#allocation9 + $0x178] sm:$0xff] %v2477_v39  ;;  %189 = vst [vmem:[#allocation9 + $0x180] sm:$0xff] %v2477_v39  ;;  %v2217_v55 = vld [vmem:[#allocation2 + $0x90] sm:$0xff]   ;;  %v2219_v57 = vld [vmem:[#allocation2 + $0x98] sm:$0xff]   ;;  %p2320_p0 = pnand %p2319_p13, %p2313_p10 }
  0x4e   :  { %190 = vst [vmem:[#allocation9 + $0x188] sm:$0xff] %v2477_v39  ;;  %191 = vst [vmem:[#allocation9 + $0x190] sm:$0xff] %v2477_v39  ;;  %v2218_v56 = vld [vmem:[#allocation5 + $0x90] sm:$0xff]   ;;  %v2220_v58 = vld [vmem:[#allocation5 + $0x98] sm:$0xff]  }
  0x4f   :  { %568 = vmatpush1.bf16.msra.mxu0 %v2174_v12  ;;  %1177 = vmatpush1.bf16.msra.mxu1 %v2174_v12  ;;  %192 = vst [vmem:[#allocation9 + $0x198] sm:$0xff] %v2477_v39  ;;  %193 = vst [vmem:[#allocation9 + $0x1a0] sm:$0xff] %v2477_v39  ;;  %v2221_v59 = vld [vmem:[#allocation2 + $0xa0] sm:$0xff]   ;;  %v2223_v61 = vld [vmem:[#allocation2 + $0xa8] sm:$0xff]  }
  0x50   :  { %569 = vmatprep.subr.bf16.mxu0 %v2175_v13  ;;  %1178 = vmatprep.subr.bf16.mxu1 %v2175_v13  ;;  %194 = vst [vmem:[#allocation9 + $0x1a8] sm:$0xff] %v2477_v39  ;;  %195 = vst [vmem:[#allocation9 + $0x1b0] sm:$0xff] %v2477_v39  ;;  %v2222_v60 = vld [vmem:[#allocation5 + $0xa0] sm:$0xff]   ;;  %v2224_v62 = vld [vmem:[#allocation5 + $0xa8] sm:$0xff]  }
  0x51   :  { %196 = vst [vmem:[#allocation9 + $0x1b8] sm:$0xff] %v2477_v39  ;;  %197 = vst [vmem:[#allocation9 + $0x1c0] sm:$0xff] %v2477_v39  ;;  %v2225_v63 = vld [vmem:[#allocation2 + $0xb0] sm:$0xff]   ;;  %v2227_v2 = vld [vmem:[#allocation2 + $0xb8] sm:$0xff]  }
  0x52   :  { %198 = vst [vmem:[#allocation9 + $0x1c8] sm:$0xff] %v2477_v39  ;;  %199 = vst [vmem:[#allocation9 + $0x1d0] sm:$0xff] %v2477_v39  ;;  %v2226_v1 = vld [vmem:[#allocation5 + $0xb0] sm:$0xff]   ;;  %v2228_v3 = vld [vmem:[#allocation5 + $0xb8] sm:$0xff]  }
  0x53   :  { %570 = vmatpush1.bf16.msra.mxu0 %v2177_v14  ;;  %1179 = vmatpush1.bf16.msra.mxu1 %v2177_v14  ;;  %200 = vst [vmem:[#allocation9 + $0x1d8] sm:$0xff] %v2477_v39  ;;  %201 = vst [vmem:[#allocation9 + $0x1e0] sm:$0xff] %v2477_v39  ;;  %v2229_v4 = vld [vmem:[#allocation2 + $0xc0] sm:$0xff]   ;;  %v2231_v6 = vld [vmem:[#allocation2 + $0xc8] sm:$0xff]  }
  0x54   :  { %571 = vmatprep.subr.bf16.mxu0 %v2178_v15  ;;  %1180 = vmatprep.subr.bf16.mxu1 %v2178_v15  ;;  %202 = vst [vmem:[#allocation9 + $0x1e8] sm:$0xff] %v2477_v39  ;;  %203 = vst [vmem:[#allocation9 + $0x1f0] sm:$0xff] %v2477_v39  ;;  %v2230_v5 = vld [vmem:[#allocation5 + $0xc0] sm:$0xff]   ;;  %v2232_v7 = vld [vmem:[#allocation5 + $0xc8] sm:$0xff]  }
  0x55   :  { %204 = vst [vmem:[#allocation9 + $0x1f8] sm:$0xff] %v2477_v39  ;;  %109 = vst [vmem:[#allocation8 + $0x128] sm:$0xff] %v2515_v42  ;;  %v2233_v8 = vld [vmem:[#allocation2 + $0xd0] sm:$0xff]   ;;  %v2235_v14 = vld [vmem:[#allocation2 + $0xd8] sm:$0xff]  }
  0x56   :  { %110 = vst [vmem:[#allocation8 + $0x130] sm:$0xff] %v2515_v42  ;;  %111 = vst [vmem:[#allocation8 + $0x138] sm:$0xff] %v2515_v42  ;;  %v2234_v9 = vld [vmem:[#allocation5 + $0xd0] sm:$0xff]   ;;  %v2236_v15 = vld [vmem:[#allocation5 + $0xd8] sm:$0xff]  }
  0x57   :  { %572 = vmatpush1.bf16.msra.mxu0 %v2180_v16  ;;  %1181 = vmatpush1.bf16.msra.mxu1 %v2180_v16  ;;  %112 = vst [vmem:[#allocation8 + $0x140] sm:$0xff] %v2515_v42  ;;  %113 = vst [vmem:[#allocation8 + $0x148] sm:$0xff] %v2515_v42 }
  0x58   :  { %114 = vst [vmem:[#allocation8 + $0x150] sm:$0xff] %v2515_v42  ;;  %115 = vst [vmem:[#allocation8 + $0x158] sm:$0xff] %v2515_v42 }
  0x59   :  { %116 = vst [vmem:[#allocation8 + $0x160] sm:$0xff] %v2515_v42  ;;  %117 = vst [vmem:[#allocation8 + $0x168] sm:$0xff] %v2515_v42 }
  0x5a   :  { %590 = vmatmul.mubr.bf16.vlgmr.msra.gmra.mrb[0].mxu0 %v2181_v17  ;;  %1199 = vmatmul.mubr.bf16.vlgmr.msra.gmra.mrb[0].mxu1 %v2182_v18  ;;  %118 = vst [vmem:[#allocation8 + $0x170] sm:$0xff] %v2515_v42  ;;  %119 = vst [vmem:[#allocation8 + $0x178] sm:$0xff] %v2515_v42 }
  0x5b   :  { %599 = vmatprep.mubr.bf16.mxu0 %v2371_v0  ;;  %1208 = vmatprep.mubr.bf16.mxu1 %v2371_v0  ;;  %120 = vst [vmem:[#allocation8 + $0x180] sm:$0xff] %v2515_v42  ;;  %121 = vst [vmem:[#allocation8 + $0x188] sm:$0xff] %v2515_v42 }
  0x5c   :  { %122 = vst [vmem:[#allocation8 + $0x190] sm:$0xff] %v2515_v42  ;;  %123 = vst [vmem:[#allocation8 + $0x198] sm:$0xff] %v2515_v42 }
  0x5d   :  { %124 = vst [vmem:[#allocation8 + $0x1a0] sm:$0xff] %v2515_v42  ;;  %125 = vst [vmem:[#allocation8 + $0x1a8] sm:$0xff] %v2515_v42 }
  0x5e   :  { %126 = vst [vmem:[#allocation8 + $0x1b0] sm:$0xff] %v2515_v42  ;;  %127 = vst [vmem:[#allocation8 + $0x1b8] sm:$0xff] %v2515_v42 }
  0x5f   :  { %128 = vst [vmem:[#allocation8 + $0x1c0] sm:$0xff] %v2515_v42  ;;  %129 = vst [vmem:[#allocation8 + $0x1c8] sm:$0xff] %v2515_v42 }
  0x60   :  { %130 = vst [vmem:[#allocation8 + $0x1d0] sm:$0xff] %v2515_v42  ;;  %131 = vst [vmem:[#allocation8 + $0x1d8] sm:$0xff] %v2515_v42 }
  0x61   :  { %132 = vst [vmem:[#allocation8 + $0x1e0] sm:$0xff] %v2515_v42  ;;  %133 = vst [vmem:[#allocation8 + $0x1e8] sm:$0xff] %v2515_v42 }
  0x62   :  { %600 = vmatmul.mubr.bf16.gmra.mrb[4].mxu0 %v2183_v19  ;;  %1209 = vmatmul.mubr.bf16.gmra.mrb[4].mxu1 %v2184_v20  ;;  %134 = vst [vmem:[#allocation8 + $0x1f0] sm:$0xff] %v2515_v42  ;;  %135 = vst [vmem:[#allocation8 + $0x1f8] sm:$0xff] %v2515_v42 }
  0x63   :  { %609 = vmatprep.mubr.bf16.mxu0 %v2371_v0  ;;  %1218 = vmatprep.mubr.bf16.mxu1 %v2371_v0 }
  0x6a   :  { %610 = vmatmul.mubr.bf16.gmra.mrb[8].mxu0 %v2185_v21  ;;  %1219 = vmatmul.mubr.bf16.gmra.mrb[8].mxu1 %v2186_v22 }
  0x6b   :  { %619 = vmatprep.mubr.bf16.mxu0 %v2371_v0  ;;  %1228 = vmatprep.mubr.bf16.mxu1 %v2371_v0 }
  0x72   :  { %620 = vmatmul.mubr.bf16.gmra.mrb[12].mxu0 %v2187_v23  ;;  %1229 = vmatmul.mubr.bf16.gmra.mrb[12].mxu1 %v2188_v24 }
  0x73   :  { %629 = vmatprep.mubr.bf16.mxu0 %v2371_v0  ;;  %1238 = vmatprep.mubr.bf16.mxu1 %v2371_v0 }
  0x7a   :  { %630 = vmatmul.mubr.bf16.gmra.mrb[16].mxu0 %v2189_v25  ;;  %1239 = vmatmul.mubr.bf16.gmra.mrb[16].mxu1 %v2190_v26 }
  0x7b   :  { %639 = vmatprep.mubr.bf16.mxu0 %v2371_v0  ;;  %1248 = vmatprep.mubr.bf16.mxu1 %v2371_v0 }
  0x82   :  { %640 = vmatmul.mubr.bf16.gmra.mrb[20].mxu0 %v2191_v27  ;;  %1249 = vmatmul.mubr.bf16.gmra.mrb[20].mxu1 %v2192_v28 }
  0x83   :  { %649 = vmatprep.mubr.bf16.mxu0 %v2371_v0  ;;  %1258 = vmatprep.mubr.bf16.mxu1 %v2371_v0 }
  0x8a   :  { %650 = vmatmul.mubr.bf16.gmra.mrb[24].mxu0 %v2193_v29  ;;  %1259 = vmatmul.mubr.bf16.gmra.mrb[24].mxu1 %v2194_v30 }
  0x8b   :  { %659 = vmatprep.mubr.bf16.mxu0 %v2371_v0  ;;  %1268 = vmatprep.mubr.bf16.mxu1 %v2371_v0 }
  0x92   :  { %660 = vmatmul.mubr.bf16.gmra.mrb[28].mxu0 %v2195_v31  ;;  %1269 = vmatmul.mubr.bf16.gmra.mrb[28].mxu1 %v2196_v32  ;;  %v2237_v32 = vld [vmem:[#allocation2 + $0xe0] sm:$0xff]  }
  0x93   :  { %669 = vmatprep.mubr.bf16.mxu0 %v2371_v0  ;;  %1278 = vmatprep.mubr.bf16.mxu1 %v2371_v0 }
  0x9a   :  { %670 = vmatmul.mubr.bf16.gmra.mrb[32].mxu0 %v2197_v33  ;;  %1279 = vmatmul.mubr.bf16.gmra.mrb[32].mxu1 %v2198_v34  ;;  %v2238_v33 = vld [vmem:[#allocation5 + $0xe0] sm:$0xff]  }
  0x9b   :  { %679 = vmatprep.mubr.bf16.mxu0 %v2371_v0  ;;  %1288 = vmatprep.mubr.bf16.mxu1 %v2371_v0 }
  0xa2   :  { %680 = vmatmul.mubr.bf16.gmra.mrb[36].mxu0 %v2199_v35  ;;  %1289 = vmatmul.mubr.bf16.gmra.mrb[36].mxu1 %v2200_v36 }
  0xa3   :  { %689 = vmatprep.mubr.bf16.mxu0 %v2371_v0  ;;  %1298 = vmatprep.mubr.bf16.mxu1 %v2371_v0 }
  0xaa   :  { %690 = vmatmul.mubr.bf16.gmra.mrb[40].mxu0 %v2201_v37  ;;  %1299 = vmatmul.mubr.bf16.gmra.mrb[40].mxu1 %v2202_v38 }
  0xab   :  { %699 = vmatprep.mubr.bf16.mxu0 %v2371_v0  ;;  %1308 = vmatprep.mubr.bf16.mxu1 %v2371_v0 }
  0xb2   :  { %700 = vmatmul.mubr.bf16.gmra.mrb[44].mxu0 %v2203_v40  ;;  %1309 = vmatmul.mubr.bf16.gmra.mrb[44].mxu1 %v2204_v41 }
  0xb3   :  { %709 = vmatprep.mubr.bf16.mxu0 %v2371_v0  ;;  %1318 = vmatprep.mubr.bf16.mxu1 %v2371_v0 }
  0xba   :  { %710 = vmatmul.mubr.bf16.gmra.mrb[48].mxu0 %v2205_v43  ;;  %1319 = vmatmul.mubr.bf16.gmra.mrb[48].mxu1 %v2206_v44 }
  0xbb   :  { %719 = vmatprep.mubr.bf16.mxu0 %v2371_v0  ;;  %1328 = vmatprep.mubr.bf16.mxu1 %v2371_v0 }
  0xc2   :  { %720 = vmatmul.mubr.bf16.gmra.mrb[52].mxu0 %v2207_v45  ;;  %1329 = vmatmul.mubr.bf16.gmra.mrb[52].mxu1 %v2208_v46 }
  0xc3   :  { %729 = vmatprep.mubr.bf16.mxu0 %v2371_v0  ;;  %1338 = vmatprep.mubr.bf16.mxu1 %v2371_v0 }
  0xca   :  { %730 = vmatmul.mubr.bf16.gmra.mrb[56].mxu0 %v2209_v47  ;;  %1339 = vmatmul.mubr.bf16.gmra.mrb[56].mxu1 %v2210_v48 }
  0xcb   :  { %739 = vmatprep.mubr.bf16.mxu0 %v2371_v0  ;;  %1348 = vmatprep.mubr.bf16.mxu1 %v2371_v0 }
  0xd2   :  { %740 = vmatmul.mubr.bf16.gmra.mrb[60].mxu0 %v2211_v49  ;;  %1349 = vmatmul.mubr.bf16.gmra.mrb[60].mxu1 %v2212_v50 }
  0xd3   :  { %749 = vmatprep.mubr.bf16.mxu0 %v2371_v0  ;;  %1358 = vmatprep.mubr.bf16.mxu1 %v2371_v0 }
  0xda   :  { %750 = vmatmul.mubr.bf16.gmra.mrb[64].mxu0 %v2213_v51  ;;  %1359 = vmatmul.mubr.bf16.gmra.mrb[64].mxu1 %v2214_v52  ;;  %v2239_v52 = vld [vmem:[#allocation2 + $0xe8] sm:$0xff]  }
  0xdb   :  { %759 = vmatprep.mubr.bf16.mxu0 %v2371_v0  ;;  %1368 = vmatprep.mubr.bf16.mxu1 %v2371_v0 }
  0xe2   :  { %760 = vmatmul.mubr.bf16.gmra.mrb[68].mxu0 %v2215_v53  ;;  %1369 = vmatmul.mubr.bf16.gmra.mrb[68].mxu1 %v2216_v54  ;;  %v2240_v53 = vld [vmem:[#allocation5 + $0xe8] sm:$0xff]  }
  0xe3   :  { %769 = vmatprep.mubr.bf16.mxu0 %v2371_v0  ;;  %1378 = vmatprep.mubr.bf16.mxu1 %v2371_v0 }
  0xea   :  { %770 = vmatmul.mubr.bf16.gmra.mrb[72].mxu0 %v2217_v55  ;;  %1379 = vmatmul.mubr.bf16.gmra.mrb[72].mxu1 %v2218_v56 }
  0xeb   :  { %779 = vmatprep.mubr.bf16.mxu0 %v2371_v0  ;;  %1388 = vmatprep.mubr.bf16.mxu1 %v2371_v0 }
  0xf2   :  { %780 = vmatmul.mubr.bf16.gmra.mrb[76].mxu0 %v2219_v57  ;;  %1389 = vmatmul.mubr.bf16.gmra.mrb[76].mxu1 %v2220_v58 }
  0xf3   :  { %789 = vmatprep.mubr.bf16.mxu0 %v2371_v0  ;;  %1398 = vmatprep.mubr.bf16.mxu1 %v2371_v0 }
  0xfa   :  { %790 = vmatmul.mubr.bf16.gmra.mrb[80].mxu0 %v2221_v59  ;;  %1399 = vmatmul.mubr.bf16.gmra.mrb[80].mxu1 %v2222_v60 }
  0xfb   :  { %799 = vmatprep.mubr.bf16.mxu0 %v2371_v0  ;;  %1408 = vmatprep.mubr.bf16.mxu1 %v2371_v0 }
 0x102   :  { %800 = vmatmul.mubr.bf16.gmra.mrb[84].mxu0 %v2223_v61  ;;  %1409 = vmatmul.mubr.bf16.gmra.mrb[84].mxu1 %v2224_v62 }
 0x103   :  { %809 = vmatprep.mubr.bf16.mxu0 %v2371_v0  ;;  %1418 = vmatprep.mubr.bf16.mxu1 %v2371_v0 }
 0x10a   :  { %810 = vmatmul.mubr.bf16.gmra.mrb[88].mxu0 %v2225_v63  ;;  %1419 = vmatmul.mubr.bf16.gmra.mrb[88].mxu1 %v2226_v1 }
 0x10b   :  { %819 = vmatprep.mubr.bf16.mxu0 %v2371_v0  ;;  %1428 = vmatprep.mubr.bf16.mxu1 %v2371_v0 }
 0x112   :  { %820 = vmatmul.mubr.bf16.gmra.mrb[92].mxu0 %v2227_v2  ;;  %1429 = vmatmul.mubr.bf16.gmra.mrb[92].mxu1 %v2228_v3 }
 0x113   :  { %829 = vmatprep.mubr.bf16.mxu0 %v2371_v0  ;;  %1438 = vmatprep.mubr.bf16.mxu1 %v2371_v0 }
 0x11a   :  { %830 = vmatmul.mubr.bf16.gmra.mrb[96].mxu0 %v2229_v4  ;;  %1439 = vmatmul.mubr.bf16.gmra.mrb[96].mxu1 %v2230_v5 }
 0x11b   :  { %839 = vmatprep.mubr.bf16.mxu0 %v2371_v0  ;;  %1448 = vmatprep.mubr.bf16.mxu1 %v2371_v0 }
 0x122   :  { %840 = vmatmul.mubr.bf16.gmra.mrb[100].mxu0 %v2231_v6  ;;  %1449 = vmatmul.mubr.bf16.gmra.mrb[100].mxu1 %v2232_v7  ;;  %v2241_v7 = vld [vmem:[#allocation2 + $0xf0] sm:$0xff]  }
 0x123   :  { %849 = vmatprep.mubr.bf16.mxu0 %v2371_v0  ;;  %1458 = vmatprep.mubr.bf16.mxu1 %v2371_v0 }
 0x12a   :  { %850 = vmatmul.mubr.bf16.gmra.mrb[104].mxu0 %v2233_v8  ;;  %1459 = vmatmul.mubr.bf16.gmra.mrb[104].mxu1 %v2234_v9  ;;  %v2242_v8 = vld [vmem:[#allocation5 + $0xf0] sm:$0xff]  }
 0x12b   :  { %859 = vmatprep.mubr.bf16.mxu0 %v2371_v0  ;;  %1468 = vmatprep.mubr.bf16.mxu1 %v2371_v0 }
 0x12d   :  { %v591_v10 = vpop.f32.mrb[0].mxu0  ;;  %v1200_v11 = vpop.f32.mrb[0].mxu1 }
 0x12e   :  { %v593_v12 = vpop.f32.mrb[1].mxu0  ;;  %v1202_v13 = vpop.f32.mrb[1].mxu1 }
 0x12f   :  { %v1839_v16 = vadd.f32 %v1200_v11, %v593_v12  ;;  %v1583_v17 = vsub.f32 %v591_v10, %v1202_v13  ;;  %v595_v18 = vpop.f32.mrb[2].mxu0  ;;  %v1204_v19 = vpop.f32.mrb[2].mxu1 }
 0x130   :  { %v597_v20 = vpop.f32.mrb[3].mxu0  ;;  %v1206_v21 = vpop.f32.mrb[3].mxu1 }
 0x131   :  { %v1903_v22 = vadd.f32 %v2477_v39, %v1839_v16  ;;  %v1647_v23 = vadd.f32 %v2515_v42, %v1583_v17  ;;  %v1840_v24 = vadd.f32 %v1204_v19, %v597_v20  ;;  %v1584_v25 = vsub.f32 %v595_v18, %v1206_v21 }
 0x132   :  { %860 = vmatmul.mubr.bf16.gmra.mrb[108].mxu0 %v2235_v14  ;;  %1469 = vmatmul.mubr.bf16.gmra.mrb[108].mxu1 %v2236_v15 }
 0x133   :  { %1967 = vst [vmem:[#allocation9] sm:$0xff] %v1903_v22  ;;  %1711 = vst [vmem:[#allocation8] sm:$0xff] %v1647_v23  ;;  %v1904_v26 = vadd.f32 %v2477_v39, %v1840_v24  ;;  %v1648_v27 = vadd.f32 %v2515_v42, %v1584_v25  ;;  %869 = vmatprep.mubr.bf16.mxu0 %v2371_v0  ;;  %1478 = vmatprep.mubr.bf16.mxu1 %v2371_v0  ;;  %v2243_v25 = vld [vmem:[#allocation2 + $0xf8] sm:$0xff]  }
 0x135   :  { %1968 = vst [vmem:[#allocation9 + $0x8] sm:$0xff] %v1904_v26  ;;  %1712 = vst [vmem:[#allocation8 + $0x8] sm:$0xff] %v1648_v27  ;;  %v601_v28 = vpop.f32.mrb[4].mxu0  ;;  %v1210_v29 = vpop.f32.mrb[4].mxu1  ;;  %v2244_v26 = vld [vmem:[#allocation5 + $0xf8] sm:$0xff]  }
 0x136   :  { %v603_v30 = vpop.f32.mrb[5].mxu0  ;;  %v1212_v31 = vpop.f32.mrb[5].mxu1 }
 0x137   :  { %v1841_v34 = vadd.f32 %v1210_v29, %v603_v30  ;;  %v1585_v35 = vsub.f32 %v601_v28, %v1212_v31  ;;  %v605_v36 = vpop.f32.mrb[6].mxu0  ;;  %v1214_v37 = vpop.f32.mrb[6].mxu1 }
 0x138   :  { %v607_v38 = vpop.f32.mrb[7].mxu0  ;;  %v1216_v40 = vpop.f32.mrb[7].mxu1 }
 0x139   :  { %v1905_v41 = vadd.f32 %v2477_v39, %v1841_v34  ;;  %v1649_v43 = vadd.f32 %v2515_v42, %v1585_v35  ;;  %v1842_v44 = vadd.f32 %v1214_v37, %v607_v38  ;;  %v1586_v45 = vsub.f32 %v605_v36, %v1216_v40 }
 0x13a   :  { %870 = vmatmul.mubr.bf16.gmra.mrb[112].mxu0 %v2237_v32  ;;  %1479 = vmatmul.mubr.bf16.gmra.mrb[112].mxu1 %v2238_v33 }
 0x13b   :  { %1969 = vst [vmem:[#allocation9 + $0x10] sm:$0xff] %v1905_v41  ;;  %1713 = vst [vmem:[#allocation8 + $0x10] sm:$0xff] %v1649_v43  ;;  %v1906_v46 = vadd.f32 %v2477_v39, %v1842_v44  ;;  %v1650_v47 = vadd.f32 %v2515_v42, %v1586_v45  ;;  %879 = vmatprep.mubr.bf16.mxu0 %v2371_v0  ;;  %1488 = vmatprep.mubr.bf16.mxu1 %v2371_v0 }
 0x13d   :  { %1970 = vst [vmem:[#allocation9 + $0x18] sm:$0xff] %v1906_v46  ;;  %1714 = vst [vmem:[#allocation8 + $0x18] sm:$0xff] %v1650_v47  ;;  %v611_v48 = vpop.f32.mrb[8].mxu0  ;;  %v1220_v49 = vpop.f32.mrb[8].mxu1 }
 0x13e   :  { %v613_v50 = vpop.f32.mrb[9].mxu0  ;;  %v1222_v51 = vpop.f32.mrb[9].mxu1 }
 0x13f   :  { %v1843_v54 = vadd.f32 %v1220_v49, %v613_v50  ;;  %v1587_v55 = vsub.f32 %v611_v48, %v1222_v51  ;;  %v615_v56 = vpop.f32.mrb[10].mxu0  ;;  %v1224_v57 = vpop.f32.mrb[10].mxu1 }
 0x140   :  { %v617_v58 = vpop.f32.mrb[11].mxu0  ;;  %v1226_v59 = vpop.f32.mrb[11].mxu1 }
 0x141   :  { %v1907_v60 = vadd.f32 %v2477_v39, %v1843_v54  ;;  %v1651_v61 = vadd.f32 %v2515_v42, %v1587_v55  ;;  %v1844_v62 = vadd.f32 %v1224_v57, %v617_v58  ;;  %v1588_v63 = vsub.f32 %v615_v56, %v1226_v59 }
 0x142   :  { %880 = vmatmul.mubr.bf16.gmra.mrb[116].mxu0 %v2239_v52  ;;  %1489 = vmatmul.mubr.bf16.gmra.mrb[116].mxu1 %v2240_v53 }
 0x143   :  { %1971 = vst [vmem:[#allocation9 + $0x20] sm:$0xff] %v1907_v60  ;;  %1715 = vst [vmem:[#allocation8 + $0x20] sm:$0xff] %v1651_v61  ;;  %v1908_v1 = vadd.f32 %v2477_v39, %v1844_v62  ;;  %v1652_v2 = vadd.f32 %v2515_v42, %v1588_v63  ;;  %889 = vmatprep.mubr.bf16.mxu0 %v2371_v0  ;;  %1498 = vmatprep.mubr.bf16.mxu1 %v2371_v0 }
 0x145   :  { %1972 = vst [vmem:[#allocation9 + $0x28] sm:$0xff] %v1908_v1  ;;  %1716 = vst [vmem:[#allocation8 + $0x28] sm:$0xff] %v1652_v2  ;;  %v621_v3 = vpop.f32.mrb[12].mxu0  ;;  %v1230_v4 = vpop.f32.mrb[12].mxu1 }
 0x146   :  { %v623_v5 = vpop.f32.mrb[13].mxu0  ;;  %v1232_v6 = vpop.f32.mrb[13].mxu1 }
 0x147   :  { %v1845_v9 = vadd.f32 %v1230_v4, %v623_v5  ;;  %v1589_v10 = vsub.f32 %v621_v3, %v1232_v6  ;;  %v625_v11 = vpop.f32.mrb[14].mxu0  ;;  %v1234_v12 = vpop.f32.mrb[14].mxu1 }
 0x148   :  { %v627_v13 = vpop.f32.mrb[15].mxu0  ;;  %v1236_v14 = vpop.f32.mrb[15].mxu1 }
 0x149   :  { %v1909_v15 = vadd.f32 %v2477_v39, %v1845_v9  ;;  %v1653_v16 = vadd.f32 %v2515_v42, %v1589_v10  ;;  %v1846_v17 = vadd.f32 %v1234_v12, %v627_v13  ;;  %v1590_v18 = vsub.f32 %v625_v11, %v1236_v14 }
 0x14a   :  { %890 = vmatmul.mubr.bf16.gmra.mrb[120].mxu0 %v2241_v7  ;;  %1499 = vmatmul.mubr.bf16.gmra.mrb[120].mxu1 %v2242_v8 }
 0x14b   :  { %1973 = vst [vmem:[#allocation9 + $0x30] sm:$0xff] %v1909_v15  ;;  %1717 = vst [vmem:[#allocation8 + $0x30] sm:$0xff] %v1653_v16  ;;  %v1910_v19 = vadd.f32 %v2477_v39, %v1846_v17  ;;  %v1654_v20 = vadd.f32 %v2515_v42, %v1590_v18  ;;  %899 = vmatprep.mubr.bf16.mxu0 %v2371_v0  ;;  %1508 = vmatprep.mubr.bf16.mxu1 %v2371_v0 }
 0x14d   :  { %1974 = vst [vmem:[#allocation9 + $0x38] sm:$0xff] %v1910_v19  ;;  %1718 = vst [vmem:[#allocation8 + $0x38] sm:$0xff] %v1654_v20  ;;  %v631_v21 = vpop.f32.mrb[16].mxu0  ;;  %v1240_v22 = vpop.f32.mrb[16].mxu1 }
 0x14e   :  { %v633_v23 = vpop.f32.mrb[17].mxu0  ;;  %v1242_v24 = vpop.f32.mrb[17].mxu1 }
 0x14f   :  { %v1847_v27 = vadd.f32 %v1240_v22, %v633_v23  ;;  %v1591_v28 = vsub.f32 %v631_v21, %v1242_v24  ;;  %v635_v29 = vpop.f32.mrb[18].mxu0  ;;  %v1244_v30 = vpop.f32.mrb[18].mxu1 }
 0x150   :  { %v637_v31 = vpop.f32.mrb[19].mxu0  ;;  %v1246_v32 = vpop.f32.mrb[19].mxu1 }
 0x151   :  { %v1911_v33 = vadd.f32 %v2477_v39, %v1847_v27  ;;  %v1655_v34 = vadd.f32 %v2515_v42, %v1591_v28  ;;  %v1848_v35 = vadd.f32 %v1244_v30, %v637_v31  ;;  %v1592_v0 = vsub.f32 %v635_v29, %v1246_v32 }
 0x152   :  { %900 = vmatmul.mubr.bf16.gmra.mrb[124].mxu0 %v2243_v25  ;;  %1509 = vmatmul.mubr.bf16.gmra.mrb[124].mxu1 %v2244_v26 }
 0x153   :  { %1975 = vst [vmem:[#allocation9 + $0x40] sm:$0xff] %v1911_v33  ;;  %1719 = vst [vmem:[#allocation8 + $0x40] sm:$0xff] %v1655_v34  ;;  %v1912_v36 = vadd.f32 %v2477_v39, %v1848_v35  ;;  %v1656_v37 = vadd.f32 %v2515_v42, %v1592_v0 }
 0x155   :  { %1976 = vst [vmem:[#allocation9 + $0x48] sm:$0xff] %v1912_v36  ;;  %1720 = vst [vmem:[#allocation8 + $0x48] sm:$0xff] %v1656_v37  ;;  %v641_v38 = vpop.f32.mrb[20].mxu0  ;;  %v1250_v40 = vpop.f32.mrb[20].mxu1 }
 0x156   :  { %v643_v41 = vpop.f32.mrb[21].mxu0  ;;  %v1252_v43 = vpop.f32.mrb[21].mxu1 }
 0x157   :  { %v1849_v44 = vadd.f32 %v1250_v40, %v643_v41  ;;  %v1593_v45 = vsub.f32 %v641_v38, %v1252_v43  ;;  %v645_v46 = vpop.f32.mrb[22].mxu0  ;;  %v1254_v47 = vpop.f32.mrb[22].mxu1 }
 0x158   :  { %v647_v48 = vpop.f32.mrb[23].mxu0  ;;  %v1256_v49 = vpop.f32.mrb[23].mxu1 }
 0x159   :  { %v1913_v50 = vadd.f32 %v2477_v39, %v1849_v44  ;;  %v1657_v51 = vadd.f32 %v2515_v42, %v1593_v45  ;;  %v1850_v52 = vadd.f32 %v1254_v47, %v647_v48  ;;  %v1594_v53 = vsub.f32 %v645_v46, %v1256_v49 }
 0x15b   :  { %1977 = vst [vmem:[#allocation9 + $0x50] sm:$0xff] %v1913_v50  ;;  %1721 = vst [vmem:[#allocation8 + $0x50] sm:$0xff] %v1657_v51  ;;  %v1914_v54 = vadd.f32 %v2477_v39, %v1850_v52  ;;  %v1658_v55 = vadd.f32 %v2515_v42, %v1594_v53 }
 0x15d   :  { %1978 = vst [vmem:[#allocation9 + $0x58] sm:$0xff] %v1914_v54  ;;  %1722 = vst [vmem:[#allocation8 + $0x58] sm:$0xff] %v1658_v55  ;;  %v651_v56 = vpop.f32.mrb[24].mxu0  ;;  %v1260_v57 = vpop.f32.mrb[24].mxu1 }
 0x15e   :  { %v653_v58 = vpop.f32.mrb[25].mxu0  ;;  %v1262_v59 = vpop.f32.mrb[25].mxu1 }
 0x15f   :  { %v1851_v60 = vadd.f32 %v1260_v57, %v653_v58  ;;  %v1595_v61 = vsub.f32 %v651_v56, %v1262_v59  ;;  %v655_v62 = vpop.f32.mrb[26].mxu0  ;;  %v1264_v63 = vpop.f32.mrb[26].mxu1 }
 0x160   :  { %v657_v1 = vpop.f32.mrb[27].mxu0  ;;  %v1266_v2 = vpop.f32.mrb[27].mxu1 }
 0x161   :  { %v1915_v3 = vadd.f32 %v2477_v39, %v1851_v60  ;;  %v1659_v4 = vadd.f32 %v2515_v42, %v1595_v61  ;;  %v1852_v5 = vadd.f32 %v1264_v63, %v657_v1  ;;  %v1596_v6 = vsub.f32 %v655_v62, %v1266_v2 }
 0x163   :  { %1979 = vst [vmem:[#allocation9 + $0x60] sm:$0xff] %v1915_v3  ;;  %1723 = vst [vmem:[#allocation8 + $0x60] sm:$0xff] %v1659_v4  ;;  %v1916_v7 = vadd.f32 %v2477_v39, %v1852_v5  ;;  %v1660_v8 = vadd.f32 %v2515_v42, %v1596_v6 }
 0x165   :  { %1980 = vst [vmem:[#allocation9 + $0x68] sm:$0xff] %v1916_v7  ;;  %1724 = vst [vmem:[#allocation8 + $0x68] sm:$0xff] %v1660_v8  ;;  %v661_v9 = vpop.f32.mrb[28].mxu0  ;;  %v1270_v10 = vpop.f32.mrb[28].mxu1 }
 0x166   :  { %v663_v11 = vpop.f32.mrb[29].mxu0  ;;  %v1272_v12 = vpop.f32.mrb[29].mxu1 }
 0x167   :  { %v1853_v13 = vadd.f32 %v1270_v10, %v663_v11  ;;  %v1597_v14 = vsub.f32 %v661_v9, %v1272_v12  ;;  %v665_v15 = vpop.f32.mrb[30].mxu0  ;;  %v1274_v16 = vpop.f32.mrb[30].mxu1 }
 0x168   :  { %v667_v17 = vpop.f32.mrb[31].mxu0  ;;  %v1276_v18 = vpop.f32.mrb[31].mxu1 }
 0x169   :  { %v1917_v19 = vadd.f32 %v2477_v39, %v1853_v13  ;;  %v1661_v20 = vadd.f32 %v2515_v42, %v1597_v14  ;;  %v1854_v21 = vadd.f32 %v1274_v16, %v667_v17  ;;  %v1598_v22 = vsub.f32 %v665_v15, %v1276_v18 }
 0x16b   :  { %1981 = vst [vmem:[#allocation9 + $0x70] sm:$0xff] %v1917_v19  ;;  %1725 = vst [vmem:[#allocation8 + $0x70] sm:$0xff] %v1661_v20  ;;  %v1918_v23 = vadd.f32 %v2477_v39, %v1854_v21  ;;  %v1662_v24 = vadd.f32 %v2515_v42, %v1598_v22 }
 0x16d   :  { %1982 = vst [vmem:[#allocation9 + $0x78] sm:$0xff] %v1918_v23  ;;  %1726 = vst [vmem:[#allocation8 + $0x78] sm:$0xff] %v1662_v24  ;;  %v671_v25 = vpop.f32.mrb[32].mxu0  ;;  %v1280_v26 = vpop.f32.mrb[32].mxu1 }
 0x16e   :  { %v673_v27 = vpop.f32.mrb[33].mxu0  ;;  %v1282_v28 = vpop.f32.mrb[33].mxu1 }
 0x16f   :  { %v1855_v29 = vadd.f32 %v1280_v26, %v673_v27  ;;  %v1599_v30 = vsub.f32 %v671_v25, %v1282_v28  ;;  %v675_v31 = vpop.f32.mrb[34].mxu0  ;;  %v1284_v32 = vpop.f32.mrb[34].mxu1 }
 0x170   :  { %v677_v33 = vpop.f32.mrb[35].mxu0  ;;  %v1286_v34 = vpop.f32.mrb[35].mxu1 }
 0x171   :  { %v1919_v35 = vadd.f32 %v2477_v39, %v1855_v29  ;;  %v1663_v0 = vadd.f32 %v2515_v42, %v1599_v30  ;;  %v1856_v36 = vadd.f32 %v1284_v32, %v677_v33  ;;  %v1600_v37 = vsub.f32 %v675_v31, %v1286_v34 }
 0x173   :  { %1983 = vst [vmem:[#allocation9 + $0x80] sm:$0xff] %v1919_v35  ;;  %1727 = vst [vmem:[#allocation8 + $0x80] sm:$0xff] %v1663_v0  ;;  %v1920_v38 = vadd.f32 %v2477_v39, %v1856_v36  ;;  %v1664_v40 = vadd.f32 %v2515_v42, %v1600_v37 }
 0x175   :  { %1984 = vst [vmem:[#allocation9 + $0x88] sm:$0xff] %v1920_v38  ;;  %1728 = vst [vmem:[#allocation8 + $0x88] sm:$0xff] %v1664_v40  ;;  %v681_v41 = vpop.f32.mrb[36].mxu0  ;;  %v1290_v43 = vpop.f32.mrb[36].mxu1 }
 0x176   :  { %v683_v44 = vpop.f32.mrb[37].mxu0  ;;  %v1292_v45 = vpop.f32.mrb[37].mxu1 }
 0x177   :  { %v1857_v46 = vadd.f32 %v1290_v43, %v683_v44  ;;  %v1601_v47 = vsub.f32 %v681_v41, %v1292_v45  ;;  %v685_v48 = vpop.f32.mrb[38].mxu0  ;;  %v1294_v49 = vpop.f32.mrb[38].mxu1 }
 0x178   :  { %v687_v50 = vpop.f32.mrb[39].mxu0  ;;  %v1296_v51 = vpop.f32.mrb[39].mxu1 }
 0x179   :  { %v1921_v52 = vadd.f32 %v2477_v39, %v1857_v46  ;;  %v1665_v53 = vadd.f32 %v2515_v42, %v1601_v47  ;;  %v1858_v54 = vadd.f32 %v1294_v49, %v687_v50  ;;  %v1602_v55 = vsub.f32 %v685_v48, %v1296_v51 }
 0x17b   :  { %1985 = vst [vmem:[#allocation9 + $0x90] sm:$0xff] %v1921_v52  ;;  %1729 = vst [vmem:[#allocation8 + $0x90] sm:$0xff] %v1665_v53  ;;  %v1922_v56 = vadd.f32 %v2477_v39, %v1858_v54  ;;  %v1666_v57 = vadd.f32 %v2515_v42, %v1602_v55 }
 0x17d   :  { %1986 = vst [vmem:[#allocation9 + $0x98] sm:$0xff] %v1922_v56  ;;  %1730 = vst [vmem:[#allocation8 + $0x98] sm:$0xff] %v1666_v57  ;;  %v691_v58 = vpop.f32.mrb[40].mxu0  ;;  %v1300_v59 = vpop.f32.mrb[40].mxu1 }
 0x17e   :  { %v693_v60 = vpop.f32.mrb[41].mxu0  ;;  %v1302_v61 = vpop.f32.mrb[41].mxu1 }
 0x17f   :  { %v1859_v62 = vadd.f32 %v1300_v59, %v693_v60  ;;  %v1603_v63 = vsub.f32 %v691_v58, %v1302_v61  ;;  %v695_v1 = vpop.f32.mrb[42].mxu0  ;;  %v1304_v2 = vpop.f32.mrb[42].mxu1 }
 0x180   :  { %v697_v3 = vpop.f32.mrb[43].mxu0  ;;  %v1306_v4 = vpop.f32.mrb[43].mxu1 }
 0x181   :  { %v1923_v5 = vadd.f32 %v2477_v39, %v1859_v62  ;;  %v1667_v6 = vadd.f32 %v2515_v42, %v1603_v63  ;;  %v1860_v7 = vadd.f32 %v1304_v2, %v697_v3  ;;  %v1604_v8 = vsub.f32 %v695_v1, %v1306_v4 }
 0x183   :  { %1987 = vst [vmem:[#allocation9 + $0xa0] sm:$0xff] %v1923_v5  ;;  %1731 = vst [vmem:[#allocation8 + $0xa0] sm:$0xff] %v1667_v6  ;;  %v1924_v9 = vadd.f32 %v2477_v39, %v1860_v7  ;;  %v1668_v10 = vadd.f32 %v2515_v42, %v1604_v8 }
 0x185   :  { %1988 = vst [vmem:[#allocation9 + $0xa8] sm:$0xff] %v1924_v9  ;;  %1732 = vst [vmem:[#allocation8 + $0xa8] sm:$0xff] %v1668_v10  ;;  %v701_v11 = vpop.f32.mrb[44].mxu0  ;;  %v1310_v12 = vpop.f32.mrb[44].mxu1 }
 0x186   :  { %v703_v13 = vpop.f32.mrb[45].mxu0  ;;  %v1312_v14 = vpop.f32.mrb[45].mxu1 }
 0x187   :  { %v1861_v15 = vadd.f32 %v1310_v12, %v703_v13  ;;  %v1605_v16 = vsub.f32 %v701_v11, %v1312_v14  ;;  %v705_v17 = vpop.f32.mrb[46].mxu0  ;;  %v1314_v18 = vpop.f32.mrb[46].mxu1 }
 0x188   :  { %v707_v19 = vpop.f32.mrb[47].mxu0  ;;  %v1316_v20 = vpop.f32.mrb[47].mxu1 }
 0x189   :  { %v1925_v21 = vadd.f32 %v2477_v39, %v1861_v15  ;;  %v1669_v22 = vadd.f32 %v2515_v42, %v1605_v16  ;;  %v1862_v23 = vadd.f32 %v1314_v18, %v707_v19  ;;  %v1606_v24 = vsub.f32 %v705_v17, %v1316_v20 }
 0x18b   :  { %1989 = vst [vmem:[#allocation9 + $0xb0] sm:$0xff] %v1925_v21  ;;  %1733 = vst [vmem:[#allocation8 + $0xb0] sm:$0xff] %v1669_v22  ;;  %v1926_v25 = vadd.f32 %v2477_v39, %v1862_v23  ;;  %v1670_v26 = vadd.f32 %v2515_v42, %v1606_v24  ;;  %v1806_v22 = vld [vmem:[#allocation9 + $0xf8] sm:$0xff] }
 0x18d   :  { %1990 = vst [vmem:[#allocation9 + $0xb8] sm:$0xff] %v1926_v25  ;;  %1734 = vst [vmem:[#allocation8 + $0xb8] sm:$0xff] %v1670_v26  ;;  %v711_v27 = vpop.f32.mrb[48].mxu0  ;;  %v1320_v28 = vpop.f32.mrb[48].mxu1 }
 0x18e   :  { %v713_v29 = vpop.f32.mrb[49].mxu0  ;;  %v1322_v30 = vpop.f32.mrb[49].mxu1 }
 0x18f   :  { %v1863_v31 = vadd.f32 %v1320_v28, %v713_v29  ;;  %v1607_v32 = vsub.f32 %v711_v27, %v1322_v30  ;;  %v715_v33 = vpop.f32.mrb[50].mxu0  ;;  %v1324_v34 = vpop.f32.mrb[50].mxu1 }
 0x190   :  { %v717_v35 = vpop.f32.mrb[51].mxu0  ;;  %v1326_v0 = vpop.f32.mrb[51].mxu1 }
 0x191   :  { %v1927_v36 = vadd.f32 %v2477_v39, %v1863_v31  ;;  %v1671_v37 = vadd.f32 %v2515_v42, %v1607_v32  ;;  %v1864_v38 = vadd.f32 %v1324_v34, %v717_v35  ;;  %v1608_v40 = vsub.f32 %v715_v33, %v1326_v0  ;;  %v1807_v33 = vld [vmem:[#allocation9 + $0x100] sm:$0xff] }
 0x193   :  { %1991 = vst [vmem:[#allocation9 + $0xc0] sm:$0xff] %v1927_v36  ;;  %1735 = vst [vmem:[#allocation8 + $0xc0] sm:$0xff] %v1671_v37  ;;  %v1928_v41 = vadd.f32 %v2477_v39, %v1864_v38  ;;  %v1672_v43 = vadd.f32 %v2515_v42, %v1608_v40  ;;  %v1808_v38 = vld [vmem:[#allocation9 + $0x108] sm:$0xff] }
 0x195   :  { %1992 = vst [vmem:[#allocation9 + $0xc8] sm:$0xff] %v1928_v41  ;;  %1736 = vst [vmem:[#allocation8 + $0xc8] sm:$0xff] %v1672_v43  ;;  %v721_v44 = vpop.f32.mrb[52].mxu0  ;;  %v1330_v45 = vpop.f32.mrb[52].mxu1 }
 0x196   :  { %v723_v46 = vpop.f32.mrb[53].mxu0  ;;  %v1332_v47 = vpop.f32.mrb[53].mxu1 }
 0x197   :  { %v1865_v48 = vadd.f32 %v1330_v45, %v723_v46  ;;  %v1609_v49 = vsub.f32 %v721_v44, %v1332_v47  ;;  %v725_v50 = vpop.f32.mrb[54].mxu0  ;;  %v1334_v51 = vpop.f32.mrb[54].mxu1 }
 0x198   :  { %v727_v52 = vpop.f32.mrb[55].mxu0  ;;  %v1336_v53 = vpop.f32.mrb[55].mxu1 }
 0x199   :  { %v1929_v54 = vadd.f32 %v2477_v39, %v1865_v48  ;;  %v1673_v55 = vadd.f32 %v2515_v42, %v1609_v49  ;;  %v1866_v56 = vadd.f32 %v1334_v51, %v727_v52  ;;  %v1610_v57 = vsub.f32 %v725_v50, %v1336_v53  ;;  %v1809_v51 = vld [vmem:[#allocation9 + $0x110] sm:$0xff] }
 0x19b   :  { %1993 = vst [vmem:[#allocation9 + $0xd0] sm:$0xff] %v1929_v54  ;;  %1737 = vst [vmem:[#allocation8 + $0xd0] sm:$0xff] %v1673_v55  ;;  %v1930_v58 = vadd.f32 %v2477_v39, %v1866_v56  ;;  %v1674_v59 = vadd.f32 %v2515_v42, %v1610_v57 }
 0x19d   :  { %1994 = vst [vmem:[#allocation9 + $0xd8] sm:$0xff] %v1930_v58  ;;  %1738 = vst [vmem:[#allocation8 + $0xd8] sm:$0xff] %v1674_v59  ;;  %v731_v60 = vpop.f32.mrb[56].mxu0  ;;  %v1340_v61 = vpop.f32.mrb[56].mxu1  ;;  %v1810_v58 = vld [vmem:[#allocation9 + $0x118] sm:$0xff] }
 0x19e   :  { %v733_v62 = vpop.f32.mrb[57].mxu0  ;;  %v1342_v63 = vpop.f32.mrb[57].mxu1 }
 0x19f   :  { %v1867_v1 = vadd.f32 %v1340_v61, %v733_v62  ;;  %v1611_v2 = vsub.f32 %v731_v60, %v1342_v63  ;;  %v735_v3 = vpop.f32.mrb[58].mxu0  ;;  %v1344_v4 = vpop.f32.mrb[58].mxu1 }
 0x1a0   :  { %v737_v5 = vpop.f32.mrb[59].mxu0  ;;  %v1346_v6 = vpop.f32.mrb[59].mxu1 }
 0x1a1   :  { %v1931_v7 = vadd.f32 %v2477_v39, %v1867_v1  ;;  %v1675_v8 = vadd.f32 %v2515_v42, %v1611_v2  ;;  %v1868_v9 = vadd.f32 %v1344_v4, %v737_v5  ;;  %v1612_v10 = vsub.f32 %v735_v3, %v1346_v6  ;;  %v1811_v6 = vld [vmem:[#allocation9 + $0x120] sm:$0xff] }
 0x1a3   :  { %1995 = vst [vmem:[#allocation9 + $0xe0] sm:$0xff] %v1931_v7  ;;  %1739 = vst [vmem:[#allocation8 + $0xe0] sm:$0xff] %v1675_v8  ;;  %v1932_v11 = vadd.f32 %v2477_v39, %v1868_v9  ;;  %v1676_v12 = vadd.f32 %v2515_v42, %v1612_v10 }
 0x1a5   :  { %1996 = vst [vmem:[#allocation9 + $0xe8] sm:$0xff] %v1932_v11  ;;  %1740 = vst [vmem:[#allocation8 + $0xe8] sm:$0xff] %v1676_v12  ;;  %v741_v13 = vpop.f32.mrb[60].mxu0  ;;  %v1350_v14 = vpop.f32.mrb[60].mxu1 }
 0x1a6   :  { %v743_v15 = vpop.f32.mrb[61].mxu0  ;;  %v1352_v16 = vpop.f32.mrb[61].mxu1 }
 0x1a7   :  { %v1869_v17 = vadd.f32 %v1350_v14, %v743_v15  ;;  %v1613_v18 = vsub.f32 %v741_v13, %v1352_v16  ;;  %v745_v19 = vpop.f32.mrb[62].mxu0  ;;  %v1354_v20 = vpop.f32.mrb[62].mxu1  ;;  %v1812_v13 = vld [vmem:[#allocation9 + $0x128] sm:$0xff] }
 0x1a8   :  { %v747_v21 = vpop.f32.mrb[63].mxu0  ;;  %v1356_v23 = vpop.f32.mrb[63].mxu1  ;;  %v1556_v15 = vld [vmem:[#allocation8 + $0x128] sm:$0xff] }
 0x1a9   :  { %v1933_v24 = vadd.f32 %v2477_v39, %v1869_v17  ;;  %v1677_v25 = vadd.f32 %v2515_v42, %v1613_v18  ;;  %v1870_v26 = vadd.f32 %v1354_v20, %v747_v21  ;;  %v1614_v27 = vsub.f32 %v745_v19, %v1356_v23  ;;  %v2245_v17 = vld [vmem:[#allocation8 + $0x128] sm:$0xff] }
 0x1ab   :  { %1997 = vst [vmem:[#allocation9 + $0xf0] sm:$0xff] %v1933_v24  ;;  %1741 = vst [vmem:[#allocation8 + $0xf0] sm:$0xff] %v1677_v25  ;;  %v1934_v28 = vadd.f32 %v1870_v26, %v1806_v22  ;;  %v1678_v29 = vadd.f32 %v2515_v42, %v1614_v27  ;;  %v1813_v25 = vld [vmem:[#allocation9 + $0x130] sm:$0xff] }
 0x1ac   :  { %v1557_v27 = vld [vmem:[#allocation8 + $0x130] sm:$0xff] }
 0x1ad   :  { %1998 = vst [vmem:[#allocation9 + $0xf8] sm:$0xff] %v1934_v28  ;;  %1742 = vst [vmem:[#allocation8 + $0xf8] sm:$0xff] %v1678_v29  ;;  %v751_v30 = vpop.f32.mrb[64].mxu0  ;;  %v1360_v31 = vpop.f32.mrb[64].mxu1 }
 0x1ae   :  { %v753_v32 = vpop.f32.mrb[65].mxu0  ;;  %v1362_v34 = vpop.f32.mrb[65].mxu1 }
 0x1af   :  { %v1871_v35 = vadd.f32 %v1360_v31, %v753_v32  ;;  %v1615_v0 = vsub.f32 %v751_v30, %v1362_v34  ;;  %v755_v36 = vpop.f32.mrb[66].mxu0  ;;  %v1364_v39 = vpop.f32.mrb[66].mxu1 }
 0x1b0   :  { %v757_v37 = vpop.f32.mrb[67].mxu0  ;;  %v1366_v40 = vpop.f32.mrb[67].mxu1 }
 0x1b1   :  { %v1935_v41 = vadd.f32 %v1871_v35, %v1807_v33  ;;  %v1679_v43 = vadd.f32 %v2515_v42, %v1615_v0  ;;  %v1872_v44 = vadd.f32 %v1364_v39, %v757_v37  ;;  %v1616_v45 = vsub.f32 %v755_v36, %v1366_v40  ;;  %v1814_v33 = vld [vmem:[#allocation9 + $0x138] sm:$0xff] }
 0x1b2   :  { %v1558_v35 = vld [vmem:[#allocation8 + $0x138] sm:$0xff] }
 0x1b3   :  { %1999 = vst [vmem:[#allocation9 + $0x100] sm:$0xff] %v1935_v41  ;;  %1743 = vst [vmem:[#allocation8 + $0x100] sm:$0xff] %v1679_v43  ;;  %v1936_v46 = vadd.f32 %v1872_v44, %v1808_v38  ;;  %v1680_v47 = vadd.f32 %v2515_v42, %v1616_v45  ;;  %v1815_v45 = vld [vmem:[#allocation9 + $0x140] sm:$0xff] }
 0x1b5   :  { %2000 = vst [vmem:[#allocation9 + $0x108] sm:$0xff] %v1936_v46  ;;  %1744 = vst [vmem:[#allocation8 + $0x108] sm:$0xff] %v1680_v47  ;;  %v761_v48 = vpop.f32.mrb[68].mxu0  ;;  %v1370_v49 = vpop.f32.mrb[68].mxu1  ;;  %v1559_v47 = vld [vmem:[#allocation8 + $0x140] sm:$0xff] }
 0x1b6   :  { %v763_v50 = vpop.f32.mrb[69].mxu0  ;;  %v1372_v52 = vpop.f32.mrb[69].mxu1 }
 0x1b7   :  { %v1873_v53 = vadd.f32 %v1370_v49, %v763_v50  ;;  %v1617_v54 = vsub.f32 %v761_v48, %v1372_v52  ;;  %v765_v55 = vpop.f32.mrb[70].mxu0  ;;  %v1374_v56 = vpop.f32.mrb[70].mxu1 }
 0x1b8   :  { %v767_v57 = vpop.f32.mrb[71].mxu0  ;;  %v1376_v59 = vpop.f32.mrb[71].mxu1 }
 0x1b9   :  { %v1937_v60 = vadd.f32 %v1873_v53, %v1809_v51  ;;  %v1681_v61 = vadd.f32 %v2515_v42, %v1617_v54  ;;  %v1874_v62 = vadd.f32 %v1374_v56, %v767_v57  ;;  %v1618_v63 = vsub.f32 %v765_v55, %v1376_v59  ;;  %v1816_v53 = vld [vmem:[#allocation9 + $0x148] sm:$0xff] }
 0x1ba   :  { %v1560_v55 = vld [vmem:[#allocation8 + $0x148] sm:$0xff] }
 0x1bb   :  { %2001 = vst [vmem:[#allocation9 + $0x110] sm:$0xff] %v1937_v60  ;;  %1745 = vst [vmem:[#allocation8 + $0x110] sm:$0xff] %v1681_v61  ;;  %v1938_v1 = vadd.f32 %v1874_v62, %v1810_v58  ;;  %v1682_v2 = vadd.f32 %v2515_v42, %v1618_v63 }
 0x1bd   :  { %2002 = vst [vmem:[#allocation9 + $0x118] sm:$0xff] %v1938_v1  ;;  %1746 = vst [vmem:[#allocation8 + $0x118] sm:$0xff] %v1682_v2  ;;  %v771_v3 = vpop.f32.mrb[72].mxu0  ;;  %v1380_v4 = vpop.f32.mrb[72].mxu1  ;;  %v1817_v2 = vld [vmem:[#allocation9 + $0x150] sm:$0xff] }
 0x1be   :  { %v773_v5 = vpop.f32.mrb[73].mxu0  ;;  %v1382_v7 = vpop.f32.mrb[73].mxu1 }
 0x1bf   :  { %v1875_v8 = vadd.f32 %v1380_v4, %v773_v5  ;;  %v1619_v9 = vsub.f32 %v771_v3, %v1382_v7  ;;  %v775_v10 = vpop.f32.mrb[74].mxu0  ;;  %v1384_v11 = vpop.f32.mrb[74].mxu1  ;;  %v1561_v4 = vld [vmem:[#allocation8 + $0x150] sm:$0xff] }
 0x1c0   :  { %v777_v12 = vpop.f32.mrb[75].mxu0  ;;  %v1386_v14 = vpop.f32.mrb[75].mxu1 }
 0x1c1   :  { %v1939_v16 = vadd.f32 %v1875_v8, %v1811_v6  ;;  %v1683_v18 = vadd.f32 %v2245_v17, %v1619_v9  ;;  %v1876_v19 = vadd.f32 %v1384_v11, %v777_v12  ;;  %v1620_v42 = vsub.f32 %v775_v10, %v1386_v14  ;;  %v1818_v10 = vld [vmem:[#allocation9 + $0x158] sm:$0xff] }
 0x1c2   :  { %v1562_v12 = vld [vmem:[#allocation8 + $0x158] sm:$0xff] }
 0x1c3   :  { %2003 = vst [vmem:[#allocation9 + $0x120] sm:$0xff] %v1939_v16  ;;  %1747 = vst [vmem:[#allocation8 + $0x120] sm:$0xff] %v1683_v18  ;;  %v1940_v20 = vadd.f32 %v1876_v19, %v1812_v13  ;;  %v1684_v21 = vadd.f32 %v1620_v42, %v1556_v15 }
 0x1c5   :  { %2004 = vst [vmem:[#allocation9 + $0x128] sm:$0xff] %v1940_v20  ;;  %1748 = vst [vmem:[#allocation8 + $0x128] sm:$0xff] %v1684_v21  ;;  %v781_v22 = vpop.f32.mrb[76].mxu0  ;;  %v1390_v23 = vpop.f32.mrb[76].mxu1  ;;  %v1819_v21 = vld [vmem:[#allocation9 + $0x160] sm:$0xff] }
 0x1c6   :  { %v783_v24 = vpop.f32.mrb[77].mxu0  ;;  %v1392_v26 = vpop.f32.mrb[77].mxu1 }
 0x1c7   :  { %v1877_v28 = vadd.f32 %v1390_v23, %v783_v24  ;;  %v1621_v29 = vsub.f32 %v781_v22, %v1392_v26  ;;  %v785_v30 = vpop.f32.mrb[78].mxu0  ;;  %v1394_v31 = vpop.f32.mrb[78].mxu1  ;;  %v1563_v23 = vld [vmem:[#allocation8 + $0x160] sm:$0xff] }
 0x1c8   :  { %v787_v32 = vpop.f32.mrb[79].mxu0  ;;  %v1396_v34 = vpop.f32.mrb[79].mxu1 }
 0x1c9   :  { %v1941_v0 = vadd.f32 %v1877_v28, %v1813_v25  ;;  %v1685_v36 = vadd.f32 %v1621_v29, %v1557_v27  ;;  %v1878_v39 = vadd.f32 %v1394_v31, %v787_v32  ;;  %v1622_v37 = vsub.f32 %v785_v30, %v1396_v34  ;;  %v1820_v29 = vld [vmem:[#allocation9 + $0x168] sm:$0xff] }
 0x1ca   :  { %v1564_v31 = vld [vmem:[#allocation8 + $0x168] sm:$0xff] }
 0x1cb   :  { %2005 = vst [vmem:[#allocation9 + $0x130] sm:$0xff] %v1941_v0  ;;  %1749 = vst [vmem:[#allocation8 + $0x130] sm:$0xff] %v1685_v36  ;;  %v1942_v38 = vadd.f32 %v1878_v39, %v1814_v33  ;;  %v1686_v40 = vadd.f32 %v1622_v37, %v1558_v35 }
 0x1cd   :  { %2006 = vst [vmem:[#allocation9 + $0x138] sm:$0xff] %v1942_v38  ;;  %1750 = vst [vmem:[#allocation8 + $0x138] sm:$0xff] %v1686_v40  ;;  %v791_v41 = vpop.f32.mrb[80].mxu0  ;;  %v1400_v43 = vpop.f32.mrb[80].mxu1  ;;  %v1821_v40 = vld [vmem:[#allocation9 + $0x170] sm:$0xff] }
 0x1ce   :  { %v793_v44 = vpop.f32.mrb[81].mxu0  ;;  %v1402_v46 = vpop.f32.mrb[81].mxu1 }
 0x1cf   :  { %v1879_v48 = vadd.f32 %v1400_v43, %v793_v44  ;;  %v1623_v49 = vsub.f32 %v791_v41, %v1402_v46  ;;  %v795_v50 = vpop.f32.mrb[82].mxu0  ;;  %v1404_v51 = vpop.f32.mrb[82].mxu1  ;;  %v1565_v43 = vld [vmem:[#allocation8 + $0x170] sm:$0xff] }
 0x1d0   :  { %v797_v52 = vpop.f32.mrb[83].mxu0  ;;  %v1406_v54 = vpop.f32.mrb[83].mxu1 }
 0x1d1   :  { %v1943_v56 = vadd.f32 %v1879_v48, %v1815_v45  ;;  %v1687_v57 = vadd.f32 %v1623_v49, %v1559_v47  ;;  %v1880_v58 = vadd.f32 %v1404_v51, %v797_v52  ;;  %v1624_v59 = vsub.f32 %v795_v50, %v1406_v54  ;;  %v1822_v49 = vld [vmem:[#allocation9 + $0x178] sm:$0xff] }
 0x1d2   :  { %v1566_v51 = vld [vmem:[#allocation8 + $0x178] sm:$0xff] }
 0x1d3   :  { %2007 = vst [vmem:[#allocation9 + $0x140] sm:$0xff] %v1943_v56  ;;  %1751 = vst [vmem:[#allocation8 + $0x140] sm:$0xff] %v1687_v57  ;;  %v1944_v60 = vadd.f32 %v1880_v58, %v1816_v53  ;;  %v1688_v61 = vadd.f32 %v1624_v59, %v1560_v55 }
 0x1d5   :  { %2008 = vst [vmem:[#allocation9 + $0x148] sm:$0xff] %v1944_v60  ;;  %1752 = vst [vmem:[#allocation8 + $0x148] sm:$0xff] %v1688_v61  ;;  %v801_v62 = vpop.f32.mrb[84].mxu0  ;;  %v1410_v63 = vpop.f32.mrb[84].mxu1  ;;  %v1823_v61 = vld [vmem:[#allocation9 + $0x180] sm:$0xff] }
 0x1d6   :  { %v803_v1 = vpop.f32.mrb[85].mxu0  ;;  %v1412_v3 = vpop.f32.mrb[85].mxu1 }
 0x1d7   :  { %v1881_v5 = vadd.f32 %v1410_v63, %v803_v1  ;;  %v1625_v6 = vsub.f32 %v801_v62, %v1412_v3  ;;  %v805_v7 = vpop.f32.mrb[86].mxu0  ;;  %v1414_v8 = vpop.f32.mrb[86].mxu1  ;;  %v1567_v63 = vld [vmem:[#allocation8 + $0x180] sm:$0xff] }
 0x1d8   :  { %v807_v9 = vpop.f32.mrb[87].mxu0  ;;  %v1416_v11 = vpop.f32.mrb[87].mxu1 }
 0x1d9   :  { %v1945_v13 = vadd.f32 %v1881_v5, %v1817_v2  ;;  %v1689_v14 = vadd.f32 %v1625_v6, %v1561_v4  ;;  %v1882_v15 = vadd.f32 %v1414_v8, %v807_v9  ;;  %v1626_v16 = vsub.f32 %v805_v7, %v1416_v11  ;;  %v1824_v6 = vld [vmem:[#allocation9 + $0x188] sm:$0xff] }
 0x1da   :  { %v1568_v8 = vld [vmem:[#allocation8 + $0x188] sm:$0xff] }
 0x1db   :  { %2009 = vst [vmem:[#allocation9 + $0x150] sm:$0xff] %v1945_v13  ;;  %1753 = vst [vmem:[#allocation8 + $0x150] sm:$0xff] %v1689_v14  ;;  %v1946_v17 = vadd.f32 %v1882_v15, %v1818_v10  ;;  %v1690_v18 = vadd.f32 %v1626_v16, %v1562_v12 }
 0x1dd   :  { %2010 = vst [vmem:[#allocation9 + $0x158] sm:$0xff] %v1946_v17  ;;  %1754 = vst [vmem:[#allocation8 + $0x158] sm:$0xff] %v1690_v18  ;;  %v811_v19 = vpop.f32.mrb[88].mxu0  ;;  %v1420_v42 = vpop.f32.mrb[88].mxu1  ;;  %v1825_v18 = vld [vmem:[#allocation9 + $0x190] sm:$0xff] }
 0x1de   :  { %v813_v20 = vpop.f32.mrb[89].mxu0  ;;  %v1422_v22 = vpop.f32.mrb[89].mxu1 }
 0x1df   :  { %v1883_v24 = vadd.f32 %v1420_v42, %v813_v20  ;;  %v1627_v25 = vsub.f32 %v811_v19, %v1422_v22  ;;  %v815_v26 = vpop.f32.mrb[90].mxu0  ;;  %v1424_v27 = vpop.f32.mrb[90].mxu1  ;;  %v1569_v42 = vld [vmem:[#allocation8 + $0x190] sm:$0xff] }
 0x1e0   :  { %v817_v28 = vpop.f32.mrb[91].mxu0  ;;  %v1426_v30 = vpop.f32.mrb[91].mxu1 }
 0x1e1   :  { %v1947_v32 = vadd.f32 %v1883_v24, %v1819_v21  ;;  %v1691_v33 = vadd.f32 %v1627_v25, %v1563_v23  ;;  %v1884_v34 = vadd.f32 %v1424_v27, %v817_v28  ;;  %v1628_v35 = vsub.f32 %v815_v26, %v1426_v30  ;;  %v1826_v25 = vld [vmem:[#allocation9 + $0x198] sm:$0xff] }
 0x1e2   :  { %v1570_v27 = vld [vmem:[#allocation8 + $0x198] sm:$0xff] }
 0x1e3   :  { %2011 = vst [vmem:[#allocation9 + $0x160] sm:$0xff] %v1947_v32  ;;  %1755 = vst [vmem:[#allocation8 + $0x160] sm:$0xff] %v1691_v33  ;;  %v1948_v0 = vadd.f32 %v1884_v34, %v1820_v29  ;;  %v1692_v36 = vadd.f32 %v1628_v35, %v1564_v31 }
 0x1e5   :  { %2012 = vst [vmem:[#allocation9 + $0x168] sm:$0xff] %v1948_v0  ;;  %1756 = vst [vmem:[#allocation8 + $0x168] sm:$0xff] %v1692_v36  ;;  %v821_v39 = vpop.f32.mrb[92].mxu0  ;;  %v1430_v37 = vpop.f32.mrb[92].mxu1  ;;  %v1827_v36 = vld [vmem:[#allocation9 + $0x1a0] sm:$0xff] }
 0x1e6   :  { %v823_v38 = vpop.f32.mrb[93].mxu0  ;;  %v1432_v41 = vpop.f32.mrb[93].mxu1 }
 0x1e7   :  { %v1885_v44 = vadd.f32 %v1430_v37, %v823_v38  ;;  %v1629_v45 = vsub.f32 %v821_v39, %v1432_v41  ;;  %v825_v46 = vpop.f32.mrb[94].mxu0  ;;  %v1434_v47 = vpop.f32.mrb[94].mxu1  ;;  %v1571_v37 = vld [vmem:[#allocation8 + $0x1a0] sm:$0xff] }
 0x1e8   :  { %v827_v48 = vpop.f32.mrb[95].mxu0  ;;  %v1436_v50 = vpop.f32.mrb[95].mxu1 }
 0x1e9   :  { %v1949_v52 = vadd.f32 %v1885_v44, %v1821_v40  ;;  %v1693_v53 = vadd.f32 %v1629_v45, %v1565_v43  ;;  %v1886_v54 = vadd.f32 %v1434_v47, %v827_v48  ;;  %v1630_v55 = vsub.f32 %v825_v46, %v1436_v50  ;;  %v1828_v45 = vld [vmem:[#allocation9 + $0x1a8] sm:$0xff] }
 0x1ea   :  { %v1572_v47 = vld [vmem:[#allocation8 + $0x1a8] sm:$0xff] }
 0x1eb   :  { %2013 = vst [vmem:[#allocation9 + $0x170] sm:$0xff] %v1949_v52  ;;  %1757 = vst [vmem:[#allocation8 + $0x170] sm:$0xff] %v1693_v53  ;;  %v1950_v56 = vadd.f32 %v1886_v54, %v1822_v49  ;;  %v1694_v57 = vadd.f32 %v1630_v55, %v1566_v51 }
 0x1ed   :  { %2014 = vst [vmem:[#allocation9 + $0x178] sm:$0xff] %v1950_v56  ;;  %1758 = vst [vmem:[#allocation8 + $0x178] sm:$0xff] %v1694_v57  ;;  %v831_v58 = vpop.f32.mrb[96].mxu0  ;;  %v1440_v59 = vpop.f32.mrb[96].mxu1  ;;  %v1829_v57 = vld [vmem:[#allocation9 + $0x1b0] sm:$0xff] }
 0x1ee   :  { %v833_v60 = vpop.f32.mrb[97].mxu0  ;;  %v1442_v62 = vpop.f32.mrb[97].mxu1 }
 0x1ef   :  { %v1887_v1 = vadd.f32 %v1440_v59, %v833_v60  ;;  %v1631_v2 = vsub.f32 %v831_v58, %v1442_v62  ;;  %v835_v3 = vpop.f32.mrb[98].mxu0  ;;  %v1444_v4 = vpop.f32.mrb[98].mxu1  ;;  %v1573_v59 = vld [vmem:[#allocation8 + $0x1b0] sm:$0xff] }
 0x1f0   :  { %v837_v5 = vpop.f32.mrb[99].mxu0  ;;  %v1446_v7 = vpop.f32.mrb[99].mxu1 }
 0x1f1   :  { %v1951_v9 = vadd.f32 %v1887_v1, %v1823_v61  ;;  %v1695_v10 = vadd.f32 %v1631_v2, %v1567_v63  ;;  %v1888_v11 = vadd.f32 %v1444_v4, %v837_v5  ;;  %v1632_v12 = vsub.f32 %v835_v3, %v1446_v7  ;;  %v1830_v2 = vld [vmem:[#allocation9 + $0x1b8] sm:$0xff] }
 0x1f2   :  { %v1574_v4 = vld [vmem:[#allocation8 + $0x1b8] sm:$0xff] }
 0x1f3   :  { %2015 = vst [vmem:[#allocation9 + $0x180] sm:$0xff] %v1951_v9  ;;  %1759 = vst [vmem:[#allocation8 + $0x180] sm:$0xff] %v1695_v10  ;;  %v1952_v13 = vadd.f32 %v1888_v11, %v1824_v6  ;;  %v1696_v14 = vadd.f32 %v1632_v12, %v1568_v8 }
 0x1f5   :  { %2016 = vst [vmem:[#allocation9 + $0x188] sm:$0xff] %v1952_v13  ;;  %1760 = vst [vmem:[#allocation8 + $0x188] sm:$0xff] %v1696_v14  ;;  %v841_v15 = vpop.f32.mrb[100].mxu0  ;;  %v1450_v16 = vpop.f32.mrb[100].mxu1  ;;  %v1831_v14 = vld [vmem:[#allocation9 + $0x1c0] sm:$0xff] }
 0x1f6   :  { %v843_v17 = vpop.f32.mrb[101].mxu0  ;;  %v1452_v19 = vpop.f32.mrb[101].mxu1 }
 0x1f7   :  { %v1889_v20 = vadd.f32 %v1450_v16, %v843_v17  ;;  %v1633_v21 = vsub.f32 %v841_v15, %v1452_v19  ;;  %v845_v22 = vpop.f32.mrb[102].mxu0  ;;  %v1454_v23 = vpop.f32.mrb[102].mxu1  ;;  %v1575_v16 = vld [vmem:[#allocation8 + $0x1c0] sm:$0xff] }
 0x1f8   :  { %v847_v24 = vpop.f32.mrb[103].mxu0  ;;  %v1456_v26 = vpop.f32.mrb[103].mxu1 }
 0x1f9   :  { %v1953_v28 = vadd.f32 %v1889_v20, %v1825_v18  ;;  %v1697_v29 = vadd.f32 %v1633_v21, %v1569_v42  ;;  %v1890_v30 = vadd.f32 %v1454_v23, %v847_v24  ;;  %v1634_v31 = vsub.f32 %v845_v22, %v1456_v26  ;;  %v1832_v21 = vld [vmem:[#allocation9 + $0x1c8] sm:$0xff] }
 0x1fa   :  { %v1576_v23 = vld [vmem:[#allocation8 + $0x1c8] sm:$0xff] }
 0x1fb   :  { %2017 = vst [vmem:[#allocation9 + $0x190] sm:$0xff] %v1953_v28  ;;  %1761 = vst [vmem:[#allocation8 + $0x190] sm:$0xff] %v1697_v29  ;;  %v1954_v32 = vadd.f32 %v1890_v30, %v1826_v25  ;;  %v1698_v33 = vadd.f32 %v1634_v31, %v1570_v27 }
 0x1fd   :  { %2018 = vst [vmem:[#allocation9 + $0x198] sm:$0xff] %v1954_v32  ;;  %1762 = vst [vmem:[#allocation8 + $0x198] sm:$0xff] %v1698_v33  ;;  %v851_v34 = vpop.f32.mrb[104].mxu0  ;;  %v1460_v35 = vpop.f32.mrb[104].mxu1  ;;  %v1833_v33 = vld [vmem:[#allocation9 + $0x1d0] sm:$0xff] }
 0x1fe   :  { %v853_v0 = vpop.f32.mrb[105].mxu0  ;;  %v1462_v39 = vpop.f32.mrb[105].mxu1 }
 0x1ff   :  { %v1891_v38 = vadd.f32 %v1460_v35, %v853_v0  ;;  %v1635_v40 = vsub.f32 %v851_v34, %v1462_v39  ;;  %v855_v41 = vpop.f32.mrb[106].mxu0  ;;  %v1464_v43 = vpop.f32.mrb[106].mxu1  ;;  %v1577_v35 = vld [vmem:[#allocation8 + $0x1d0] sm:$0xff] }
 0x200   :  { %v857_v44 = vpop.f32.mrb[107].mxu0  ;;  %v1466_v46 = vpop.f32.mrb[107].mxu1 }
 0x201   :  { %v1955_v48 = vadd.f32 %v1891_v38, %v1827_v36  ;;  %v1699_v49 = vadd.f32 %v1635_v40, %v1571_v37  ;;  %v1892_v50 = vadd.f32 %v1464_v43, %v857_v44  ;;  %v1636_v51 = vsub.f32 %v855_v41, %v1466_v46  ;;  %v1834_v40 = vld [vmem:[#allocation9 + $0x1d8] sm:$0xff] }
 0x202   :  { %v1578_v43 = vld [vmem:[#allocation8 + $0x1d8] sm:$0xff] }
 0x203   :  { %2019 = vst [vmem:[#allocation9 + $0x1a0] sm:$0xff] %v1955_v48  ;;  %1763 = vst [vmem:[#allocation8 + $0x1a0] sm:$0xff] %v1699_v49  ;;  %v1956_v52 = vadd.f32 %v1892_v50, %v1828_v45  ;;  %v1700_v53 = vadd.f32 %v1636_v51, %v1572_v47 }
 0x205   :  { %2020 = vst [vmem:[#allocation9 + $0x1a8] sm:$0xff] %v1956_v52  ;;  %1764 = vst [vmem:[#allocation8 + $0x1a8] sm:$0xff] %v1700_v53  ;;  %v861_v54 = vpop.f32.mrb[108].mxu0  ;;  %v1470_v55 = vpop.f32.mrb[108].mxu1  ;;  %v1835_v53 = vld [vmem:[#allocation9 + $0x1e0] sm:$0xff] }
 0x206   :  { %v863_v56 = vpop.f32.mrb[109].mxu0  ;;  %v1472_v58 = vpop.f32.mrb[109].mxu1 }
 0x207   :  { %v1893_v60 = vadd.f32 %v1470_v55, %v863_v56  ;;  %v1637_v61 = vsub.f32 %v861_v54, %v1472_v58  ;;  %v865_v62 = vpop.f32.mrb[110].mxu0  ;;  %v1474_v63 = vpop.f32.mrb[110].mxu1  ;;  %v1579_v55 = vld [vmem:[#allocation8 + $0x1e0] sm:$0xff] }
 0x208   :  { %v867_v1 = vpop.f32.mrb[111].mxu0  ;;  %v1476_v3 = vpop.f32.mrb[111].mxu1 }
 0x209   :  { %v1957_v5 = vadd.f32 %v1893_v60, %v1829_v57  ;;  %v1701_v6 = vadd.f32 %v1637_v61, %v1573_v59  ;;  %v1894_v7 = vadd.f32 %v1474_v63, %v867_v1  ;;  %v1638_v8 = vsub.f32 %v865_v62, %v1476_v3  ;;  %v1836_v61 = vld [vmem:[#allocation9 + $0x1e8] sm:$0xff] }
 0x20a   :  { %v1580_v63 = vld [vmem:[#allocation8 + $0x1e8] sm:$0xff] }
 0x20b   :  { %2021 = vst [vmem:[#allocation9 + $0x1b0] sm:$0xff] %v1957_v5  ;;  %1765 = vst [vmem:[#allocation8 + $0x1b0] sm:$0xff] %v1701_v6  ;;  %v1958_v9 = vadd.f32 %v1894_v7, %v1830_v2  ;;  %v1702_v10 = vadd.f32 %v1638_v8, %v1574_v4 }
 0x20d   :  { %2022 = vst [vmem:[#allocation9 + $0x1b8] sm:$0xff] %v1958_v9  ;;  %1766 = vst [vmem:[#allocation8 + $0x1b8] sm:$0xff] %v1702_v10  ;;  %v871_v11 = vpop.f32.mrb[112].mxu0  ;;  %v1480_v12 = vpop.f32.mrb[112].mxu1  ;;  %v1837_v10 = vld [vmem:[#allocation9 + $0x1f0] sm:$0xff] }
 0x20e   :  { %v873_v13 = vpop.f32.mrb[113].mxu0  ;;  %v1482_v15 = vpop.f32.mrb[113].mxu1 }
 0x20f   :  { %v1895_v17 = vadd.f32 %v1480_v12, %v873_v13  ;;  %v1639_v18 = vsub.f32 %v871_v11, %v1482_v15  ;;  %v875_v19 = vpop.f32.mrb[114].mxu0  ;;  %v1484_v42 = vpop.f32.mrb[114].mxu1  ;;  %v1581_v12 = vld [vmem:[#allocation8 + $0x1f0] sm:$0xff] }
 0x210   :  { %v877_v20 = vpop.f32.mrb[115].mxu0  ;;  %v1486_v22 = vpop.f32.mrb[115].mxu1 }
 0x211   :  { %v1959_v24 = vadd.f32 %v1895_v17, %v1831_v14  ;;  %v1703_v25 = vadd.f32 %v1639_v18, %v1575_v16  ;;  %v1896_v26 = vadd.f32 %v1484_v42, %v877_v20  ;;  %v1640_v27 = vsub.f32 %v875_v19, %v1486_v22  ;;  %v1838_v18 = vld [vmem:[#allocation9 + $0x1f8] sm:$0xff] }
 0x212   :  { %v1582_v42 = vld [vmem:[#allocation8 + $0x1f8] sm:$0xff] }
 0x213   :  { %2023 = vst [vmem:[#allocation9 + $0x1c0] sm:$0xff] %v1959_v24  ;;  %1767 = vst [vmem:[#allocation8 + $0x1c0] sm:$0xff] %v1703_v25  ;;  %v1960_v28 = vadd.f32 %v1896_v26, %v1832_v21  ;;  %v1704_v29 = vadd.f32 %v1640_v27, %v1576_v23 }
 0x215   :  { %2024 = vst [vmem:[#allocation9 + $0x1c8] sm:$0xff] %v1960_v28  ;;  %1768 = vst [vmem:[#allocation8 + $0x1c8] sm:$0xff] %v1704_v29  ;;  %v881_v30 = vpop.f32.mrb[116].mxu0  ;;  %v1490_v31 = vpop.f32.mrb[116].mxu1 }
 0x216   :  { %v883_v32 = vpop.f32.mrb[117].mxu0  ;;  %v1492_v34 = vpop.f32.mrb[117].mxu1 }
 0x217   :  { %v1897_v0 = vadd.f32 %v1490_v31, %v883_v32  ;;  %v1641_v36 = vsub.f32 %v881_v30, %v1492_v34  ;;  %v885_v39 = vpop.f32.mrb[118].mxu0  ;;  %v1494_v37 = vpop.f32.mrb[118].mxu1 }
 0x218   :  { %v887_v38 = vpop.f32.mrb[119].mxu0  ;;  %v1496_v41 = vpop.f32.mrb[119].mxu1 }
 0x219   :  { %v1961_v44 = vadd.f32 %v1897_v0, %v1833_v33  ;;  %v1705_v45 = vadd.f32 %v1641_v36, %v1577_v35  ;;  %v1898_v46 = vadd.f32 %v1494_v37, %v887_v38  ;;  %v1642_v47 = vsub.f32 %v885_v39, %v1496_v41 }
 0x21b   :  { %2025 = vst [vmem:[#allocation9 + $0x1d0] sm:$0xff] %v1961_v44  ;;  %1769 = vst [vmem:[#allocation8 + $0x1d0] sm:$0xff] %v1705_v45  ;;  %v1962_v48 = vadd.f32 %v1898_v46, %v1834_v40  ;;  %v1706_v49 = vadd.f32 %v1642_v47, %v1578_v43 }
 0x21d   :  { %2026 = vst [vmem:[#allocation9 + $0x1d8] sm:$0xff] %v1962_v48  ;;  %1770 = vst [vmem:[#allocation8 + $0x1d8] sm:$0xff] %v1706_v49  ;;  %v891_v50 = vpop.f32.mrb[120].mxu0  ;;  %v1500_v51 = vpop.f32.mrb[120].mxu1 }
 0x21e   :  { %v893_v52 = vpop.f32.mrb[121].mxu0  ;;  %v1502_v54 = vpop.f32.mrb[121].mxu1 }
 0x21f   :  { %v1899_v56 = vadd.f32 %v1500_v51, %v893_v52  ;;  %v1643_v57 = vsub.f32 %v891_v50, %v1502_v54  ;;  %v895_v58 = vpop.f32.mrb[122].mxu0  ;;  %v1504_v59 = vpop.f32.mrb[122].mxu1 }
 0x220   :  { %v897_v60 = vpop.f32.mrb[123].mxu0  ;;  %v1506_v62 = vpop.f32.mrb[123].mxu1 }
 0x221   :  { %v1963_v1 = vadd.f32 %v1899_v56, %v1835_v53  ;;  %v1707_v2 = vadd.f32 %v1643_v57, %v1579_v55  ;;  %v1900_v3 = vadd.f32 %v1504_v59, %v897_v60  ;;  %v1644_v4 = vsub.f32 %v895_v58, %v1506_v62 }
 0x223   :  { %2027 = vst [vmem:[#allocation9 + $0x1e0] sm:$0xff] %v1963_v1  ;;  %1771 = vst [vmem:[#allocation8 + $0x1e0] sm:$0xff] %v1707_v2  ;;  %v1964_v5 = vadd.f32 %v1900_v3, %v1836_v61  ;;  %v1708_v6 = vadd.f32 %v1644_v4, %v1580_v63 }
 0x225   :  { %2028 = vst [vmem:[#allocation9 + $0x1e8] sm:$0xff] %v1964_v5  ;;  %1772 = vst [vmem:[#allocation8 + $0x1e8] sm:$0xff] %v1708_v6  ;;  %v901_v7 = vpop.f32.mrb[124].mxu0  ;;  %v1510_v8 = vpop.f32.mrb[124].mxu1 }
 0x226   :  { %v903_v9 = vpop.f32.mrb[125].mxu0  ;;  %v1512_v11 = vpop.f32.mrb[125].mxu1 }
 0x227   :  { %v1901_v13 = vadd.f32 %v1510_v8, %v903_v9  ;;  %v1645_v14 = vsub.f32 %v901_v7, %v1512_v11  ;;  %v905_v15 = vpop.f32.mrb[126].mxu0  ;;  %v1514_v16 = vpop.f32.mrb[126].mxu1 }
 0x228   :  { %v907_v17 = vpop.f32.mrb[127].mxu0  ;;  %v1516_v19 = vpop.f32.mrb[127].mxu1 }
 0x229   :  { %v1965_v20 = vadd.f32 %v1901_v13, %v1837_v10  ;;  %v1709_v21 = vadd.f32 %v1645_v14, %v1581_v12  ;;  %v1902_v22 = vadd.f32 %v1514_v16, %v907_v17  ;;  %v1646_v23 = vsub.f32 %v905_v15, %v1516_v19 }
 0x22b   :  { %2029 = vst [vmem:[#allocation9 + $0x1f0] sm:$0xff] %v1965_v20  ;;  %1773 = vst [vmem:[#allocation8 + $0x1f0] sm:$0xff] %v1709_v21  ;;  %v1966_v24 = vadd.f32 %v1902_v22, %v1838_v18  ;;  %v1710_v25 = vadd.f32 %v1646_v23, %v1582_v42 }
 0x22d   :  { %2030 = vst [vmem:[#allocation9 + $0x1f8] sm:$0xff] %v1966_v24  ;;  %1774 = vst [vmem:[#allocation8 + $0x1f8] sm:$0xff] %v1710_v25 }
 0x22e   :  { %2323 = shalt.err (!%p2320_p0)
}
 0x22f   :  { %s2324_s15 = scalar_lea.hbm %s2692_s4, 8192 }
 0x230   :  { %p2325_p1 = scmp.ne.s32.totalorder %s2692_s4, %s2324_s15  ;;  %p2328_p2 = scmp.lt.u32.totalorder %s2324_s15, %s2692_s4 }
 0x232   :  { %p2330_p3 = pnand %p2328_p2, %p2325_p1 }
 0x234   :  { %2333 = shalt.err (!%p2330_p3)
}
 0x235   :  { %2042 = dma.vmem_to_hbm [thread:$0]  %s2037_s9, 8192, %s2692_s4, [#allocation4], %s2369_s0, %s2369_s0, %s2370_s21  }
 0x236   :  { %s2334_s22 = scalar_lea.vmem %s2651_s11, 8192  ;;  %p2339_p5 = scmp.lt.s32.totalorder %s2651_s11, %s2651_s11 }
 0x237   :  { %p2335_p4 = scmp.ne.s32.totalorder %s2651_s11, %s2334_s22  ;;  %p2340_p6 = scmp.lt.s32.totalorder %s2334_s22, %s2334_s22 }
 0x239   :  { %p2341_p7 = por %p2340_p6, %p2339_p5 }
 0x23b   :  { %p2342_p8 = pnand %p2341_p7, %p2335_p4 }
 0x23d   :  { %2345 = shalt.err (!%p2342_p8)
}
 0x23e   :  { %s2346_s25 = scalar_lea.hbm %s2693_s5, 8192 }
 0x23f   :  { %p2347_p9 = scmp.ne.s32.totalorder %s2693_s5, %s2346_s25  ;;  %p2350_p10 = scmp.lt.u32.totalorder %s2346_s25, %s2693_s5 }
 0x241   :  { %p2352_p11 = pnand %p2350_p10, %p2347_p9 }
 0x243   :  { %2355 = shalt.err (!%p2352_p11)
}
 0x244   :  { %2054 = dma.vmem_to_hbm [thread:$0]  %s2651_s11, 8192, %s2693_s5, [#allocation10], %s2369_s0, %s2369_s0, %s2370_s21  }
 0x245   :  { %2360 = dma.done.wait [#allocation4], 8192  }
 0x246   :  { %2361 = vsyncadd [#allocation4], 4294959104 }
 0x247   :  { %2362 = dma.done.wait [#allocation10], 8192  }
 0x248   :  { %2363 = vsyncadd [#allocation10], 4294959104 }
 0x249   :  { %2061 = vsyncpa [#allocation3], 1 }
 0x24a   :  { %2062 = vsyncpa [#allocation6], 1 }
 0x24b   :  { %2063 = vsyncpa [#allocation4], 1 }
 0x24c   :  { %2064 = vsyncpa [#allocation10], 1 }

</bundles_post_ra>
